<compile_context>
chip_gen: v7x
topology: tpu7x:2x2x1
jax: 0.10.0
libtpu: 0.0.40
codegen_flags: <defaults>
</compile_context>

<pallas_src>
import math
import functools

import jax
import jax.numpy as jnp
from jax import lax
from jax.experimental import pallas as pl
from jax.experimental.pallas import tpu as pltpu


# ---------------------------------------------------------------------------
# Hardware-aware configuration
# ---------------------------------------------------------------------------
@functools.lru_cache(maxsize=None)
def _vmem_capacity_bytes():
    try:
        return int(pltpu.get_tpu_info().vmem_capacity_bytes)
    except Exception:
        return 128 * 1024 * 1024


@functools.lru_cache(maxsize=None)
def _hw_config():
    cap = _vmem_capacity_bytes()
    small_vmem = cap <= 80 * 1024 * 1024      # v7x: 64 MiB per TensorCore
    return {
        "vmem_limit": (48 if small_vmem else 100) * 1024 * 1024,
        "tq_cap": 128 if small_vmem else 256,
        "tv_cap": 512 if small_vmem else 1024,
    }


def _probe_copy_kernel(x_ref, o_ref):
    o_ref[...] = x_ref[...]


@functools.lru_cache(maxsize=None)
def _buffered_one_supported():
    # Probe whether pipeline_mode=pl.Buffered(1) lowers on this jax/libtpu.
    try:
        spec = pl.BlockSpec((8, 128), lambda i: (0, 0),
                            pipeline_mode=pl.Buffered(buffer_count=1))
        out = pl.pallas_call(
            _probe_copy_kernel,
            grid=(1,),
            in_specs=[spec],
            out_specs=pl.BlockSpec((8, 128), lambda i: (0, 0)),
            out_shape=jax.ShapeDtypeStruct((8, 128), jnp.float32),
        )(jnp.zeros((8, 128), jnp.float32))
        jax.block_until_ready(out)
        return True
    except Exception:
        return False


def _const_spec(shape):
    """BlockSpec for a grid-invariant operand (weights/biases): single-buffered."""
    index_map = lambda *_: (0,) * len(shape)
    if _buffered_one_supported():
        return pl.BlockSpec(shape, index_map,
                            pipeline_mode=pl.Buffered(buffer_count=1))
    return pl.BlockSpec(shape, index_map)


def _seq_tile(S, cap):
    if S <= cap:
        return S
    for t in (cap, 256, 128):
        if t <= cap and S % t == 0:
            return t
    return S


def _vocab_tile(V, cap):
    if V <= cap:
        return V
    for t in (cap, 1024, 512, 256, 128):
        if t <= cap and V % t == 0:
            return t
    return V


# ---------------------------------------------------------------------------
# Math helpers (f32)
# ---------------------------------------------------------------------------
def _erf_poly(x):
    # Abramowitz & Stegun 7.1.26 polynomial erf, |err| <= 1.5e-7 (~f32 eps).
    # TODO(synk): exact lax.erf may not lower in Mosaic; exact GELU uses this poly.
    a1, a2, a3, a4, a5 = 0.254829592, -0.284496736, 1.421413741, -1.453152027, 1.061405429
    p = 0.3275911
    ax = jnp.abs(x)
    t = 1.0 / (1.0 + p * ax)
    poly = ((((a5 * t + a4) * t + a3) * t + a2) * t + a1) * t
    y = 1.0 - poly * jnp.exp(-ax * ax)
    return jnp.where(x >= 0, y, -y)


def _gelu(x):
    # nn.GELU() default = exact (erf-based) GELU.
    return 0.5 * x * (1.0 + _erf_poly(x * (1.0 / math.sqrt(2.0))))


def _layernorm(x, gamma, beta, eps=1e-5):
    mean = jnp.mean(x, axis=-1, keepdims=True)
    var = jnp.mean((x - mean) ** 2, axis=-1, keepdims=True)
    return (x - mean) * jax.lax.rsqrt(var + eps) * gamma + beta


def _softmax_rows(s):
    m = jnp.max(s, axis=-1, keepdims=True)
    e = jnp.exp(s - m)
    denom = jnp.sum(e, axis=-1, keepdims=True)
    # Exact reciprocal: sims are a returned model output (approx=True would be
    # a user-visible divergence from the torch reference).
    return e * (1.0 / denom)


# ---------------------------------------------------------------------------
# Encoder block kernel: one (batch, q-tile) grid step does fused-QKV attention,
# residual + LN1, the MLP (Linear -> GELU -> Linear), residual + LN2.
# K/V projection for the whole sequence is computed once per batch element at
# qi == 0 and cached in a persistent VMEM scratch.
# ---------------------------------------------------------------------------
def encoder_block_kernel(xq_ref, xs_ref, wq_ref, wkv_ref, wfc_ref, bfc_ref,
                         g1_ref, be1_ref,
                         w1_ref, b1_ref, w2_ref, b2_ref,
                         g2_ref, be2_ref,
                         out_ref, sim_ref,
                         kv_scratch, oall_scratch,
                         *, num_heads, head_dim):
    H, Dh = num_heads, head_dim
    E = H * Dh
    S = xs_ref.shape[1]

    # K/V projection once per batch element (qi axis is "arbitrary" so the
    # scratch stays valid across all query tiles of this batch element).
    @pl.when(pl.program_id(1) == 0)
    def _():
        kv_scratch[...] = jnp.dot(
            xs_ref[0], wkv_ref[...],
            preferred_element_type=jnp.float32).astype(jnp.bfloat16)   # (S, 2E)

    xq = xq_ref[0]                        # (tq, E) f32 — residual / LN path
    xq_bf = xq.astype(jnp.bfloat16)

    # Fused Q projection (1/head_dim score scale folded into wq by the wrapper).
    q_all = jnp.dot(xq_bf, wq_ref[...], preferred_element_type=jnp.float32)  # (tq, E)

    # TODO(synk): for very large H switch to lax.fori_loop with pl.ds head
    # slices; static unroll is fine for typical H<=16 since per-head results go
    # straight to VMEM scratch / the sim output (no carried accumulator).
    for h in range(H):
        q_h = q_all[:, h * Dh:(h + 1) * Dh].astype(jnp.bfloat16)       # (tq, Dh)
        k_h = kv_scratch[:, h * Dh:(h + 1) * Dh]                       # (S, Dh) bf16
        v_h = kv_scratch[:, E + h * Dh:E + (h + 1) * Dh]               # (S, Dh) bf16

        # QK^T without materializing a transpose (contract last dims).
        s = lax.dot_general(q_h, k_h, (((1,), (1,)), ((), ())),
                            preferred_element_type=jnp.float32)        # (tq, S)
        sim = _softmax_rows(s)                                         # (tq, S) f32
        # Module layout directly: sims concatenated over heads along last dim.
        # Lane-aligned (unmasked vst) whenever S % 128 == 0.
        sim_ref[0, :, h * S:(h + 1) * S] = sim

        o_h = jnp.dot(sim.astype(jnp.bfloat16), v_h,
                      preferred_element_type=jnp.float32)              # (tq, Dh)
        oall_scratch[:, h * Dh:(h + 1) * Dh] = o_h.astype(jnp.bfloat16)

    # One full-depth (K = E) output projection instead of H small-K GEMMs.
    acc = jnp.dot(oall_scratch[...], wfc_ref[...],
                  preferred_element_type=jnp.float32)                  # (tq, E)

    # MultiHeadAttention: fc bias + ReLU.
    y = jnp.maximum(acc + bfc_ref[...], 0.0)

    # residual + LayerNorm 1 (f32).
    x1 = _layernorm(xq + y, g1_ref[...], be1_ref[...])

    # MLP([E, HID, E], GELU) — Linear -> GELU -> Linear, bf16 matmuls, f32 rest.
    # TODO(synk): on v7x with very large HID, tile HID as an extra "arbitrary"
    # grid axis (or split the MLP into its own pallas_call) to stay within 64 MiB VMEM.
    h1 = _gelu(jnp.dot(x1.astype(jnp.bfloat16), w1_ref[...],
                       preferred_element_type=jnp.float32) + b1_ref[...])
    m = jnp.dot(h1.astype(jnp.bfloat16), w2_ref[...],
                preferred_element_type=jnp.float32) + b2_ref[...]

    # residual + LayerNorm 2 (f32).
    out_ref[0] = _layernorm(x1 + m, g2_ref[...], be2_ref[...])


def encoder_block(x, p):
    B, S, E = x.shape
    H, _, Dh = p["wq"].shape
    HID = p["w1"].shape[1]
    cfg = _hw_config()
    tq = _seq_tile(S, cfg["tq_cap"])
    nq = S // tq

    # K/V source pre-cast to bf16 in the wrapper (halves the xs DMA per step
    # and removes a per-step cast).  The query operand stays f32 so residual +
    # LayerNorm run in full precision.
    x_bf = x.astype(jnp.bfloat16)

    # ---- wrapper-side weight re-layout (pure layout plumbing, bf16 halves DMA) ----
    wq_f = (jnp.transpose(p["wq"], (1, 0, 2)).reshape(E, E)
            * (1.0 / float(Dh))).astype(jnp.bfloat16)                 # scale folded in
    wk_f = jnp.transpose(p["wk"], (1, 0, 2)).reshape(E, E)
    wv_f = jnp.transpose(p["wv"], (1, 0, 2)).reshape(E, E)
    wkv_f = jnp.concatenate([wk_f, wv_f], axis=-1).astype(jnp.bfloat16)  # (E, 2E)
    wfc_bf = p["wfc"].astype(jnp.bfloat16)                               # (E, E)
    w1_bf = p["w1"].astype(jnp.bfloat16)
    w2_bf = p["w2"].astype(jnp.bfloat16)

    kernel = functools.partial(encoder_block_kernel, num_heads=H, head_dim=Dh)

    # Advisory cost estimate for the XLA scheduler.
    flops = int(B * (8 * S * E * E + 4 * S * S * E + 4 * S * E * HID))
    transc = int(B * (H * S * S + S * HID))
    wbytes = 2 * (4 * E * E + 2 * E * HID) + 4 * (6 * E + HID)
    bytes_acc = int(wbytes + B * (4 * S * E + 2 * S * E + 4 * S * E + 4 * H * S * S))

    out, sim = pl.pallas_call(
        kernel,
        grid=(B, nq),
        in_specs=[
            pl.BlockSpec((1, tq, E), lambda b, qi: (b, qi, 0)),   # f32 query rows
            pl.BlockSpec((1, S, E), lambda b, qi: (b, 0, 0)),     # bf16 full seq (K/V src)
            _const_spec((E, E)),                                  # fused, scaled Wq
            _const_spec((E, 2 * E)),                              # fused Wk|Wv
            _const_spec((E, E)),                                  # Wfc
            _const_spec((1, E)),                                  # bfc
            _const_spec((1, E)), _const_spec((1, E)),             # LN1
            _const_spec((E, HID)), _const_spec((1, HID)),
            _const_spec((HID, E)), _const_spec((1, E)),           # MLP
            _const_spec((1, E)), _const_spec((1, E)),             # LN2
        ],
        out_specs=(
            pl.BlockSpec((1, tq, E), lambda b, qi: (b, qi, 0)),
            pl.BlockSpec((1, tq, H * S), lambda b, qi: (b, qi, 0)),   # sims, module layout
        ),
        out_shape=(
            jax.ShapeDtypeStruct((B, S, E), jnp.float32),
            # TODO(synk): consider bf16 sims on v5e (halves dominant HBM writeback)
            # once the numerics are signed off — sims are a model output.
            jax.ShapeDtypeStruct((B, S, H * S), jnp.float32),
        ),
        scratch_shapes=[
            pltpu.VMEM((S, 2 * E), jnp.bfloat16),   # persistent K/V projection
            pltpu.VMEM((tq, E), jnp.bfloat16),      # concat of per-head outputs
        ],
        compiler_params=pltpu.CompilerParams(
            dimension_semantics=("parallel", "arbitrary"),
            vmem_limit_bytes=cfg["vmem_limit"]),
        cost_estimate=pl.CostEstimate(flops=flops, transcendentals=transc,
                                      bytes_accessed=bytes_acc),
    )(x, x_bf, wq_f, wkv_f, wfc_bf, p["bfc"], p["g1"], p["be1"],
      w1_bf, p["b1"], w2_bf, p["b2"], p["g2"], p["be2"])

    return out, sim


# ---------------------------------------------------------------------------
# LM head: seq-tiled + vocab-tiled Linear(E, V); bf16 input is pre-cast in the wrapper.
# ---------------------------------------------------------------------------
def head_kernel(x_ref, w_ref, b_ref, out_ref):
    out_ref[0] = (jnp.dot(x_ref[0], w_ref[...], preferred_element_type=jnp.float32)
                  + b_ref[...])


def lm_head(x_bf, w, b):
    B, S, E = x_bf.shape
    V = w.shape[1]
    cfg = _hw_config()
    ts = _seq_tile(S, cfg["tq_cap"])
    ns = S // ts
    tv = _vocab_tile(V, cfg["tv_cap"])
    nv = V // tv
    w_bf = w.astype(jnp.bfloat16)

    flops = int(2 * B * S * E * V)
    bytes_acc = int(B * ns * nv * (2 * ts * E + 2 * E * tv + 4 * tv) + 4 * B * S * V)

    return pl.pallas_call(
        head_kernel,
        grid=(B, ns, nv),
        in_specs=[
            pl.BlockSpec((1, ts, E), lambda b, si, vi: (b, si, 0)),
            pl.BlockSpec((E, tv), lambda b, si, vi: (0, vi)),
            pl.BlockSpec((1, tv), lambda b, si, vi: (0, vi)),
        ],
        out_specs=pl.BlockSpec((1, ts, tv), lambda b, si, vi: (b, si, vi)),
        out_shape=jax.ShapeDtypeStruct((B, S, V), jnp.float32),
        compiler_params=pltpu.CompilerParams(
            dimension_semantics=("parallel", "parallel", "parallel"),
            vmem_limit_bytes=cfg["vmem_limit"]),
        cost_estimate=pl.CostEstimate(flops=flops, transcendentals=0,
                                      bytes_accessed=bytes_acc),
    )(x_bf, w_bf, b)


# ---------------------------------------------------------------------------
# Params / glue
# ---------------------------------------------------------------------------
def make_positional_encoding(embed_dim, max_len=512):
    pos = jnp.arange(max_len, dtype=jnp.float32)[:, None]
    div = jnp.exp(jnp.arange(0, embed_dim, 2, dtype=jnp.float32)
                  * (-math.log(10000.0) / embed_dim))
    pe = jnp.zeros((max_len, embed_dim), jnp.float32)
    pe = pe.at[:, 0::2].set(jnp.sin(pos * div))
    pe = pe.at[:, 1::2].set(jnp.cos(pos * div))
    return pe[:, None, :]   # (max_len, 1, embed_dim) — same layout as the torch buffer


def init_params(key, vocab, E, H, HID, num_blocks):
    Dh = E // H
    ks = iter(jax.random.split(key, 4 + num_blocks * 9))

    def lin(k, din, dout):
        return jax.random.normal(k, (din, dout), jnp.float32) / math.sqrt(din)

    params = {
        "embed": jax.random.normal(next(ks), (vocab, E), jnp.float32),
        "pe": make_positional_encoding(E),
        "w_head": lin(next(ks), E, vocab),
        "b_head": jax.random.normal(next(ks), (1, vocab), jnp.float32) * 0.01,
        "blocks": [],
    }
    for _ in range(num_blocks):
        blk = {
            "wq": jax.random.normal(next(ks), (H, E, Dh), jnp.float32) / math.sqrt(E),
            "wk": jax.random.normal(next(ks), (H, E, Dh), jnp.float32) / math.sqrt(E),
            "wv": jax.random.normal(next(ks), (H, E, Dh), jnp.float32) / math.sqrt(E),
            "wfc": lin(next(ks), E, E),
            "bfc": jax.random.normal(next(ks), (1, E), jnp.float32) * 0.01,
            "g1": jnp.ones((1, E), jnp.float32),
            "be1": jnp.zeros((1, E), jnp.float32),
            "w1": lin(next(ks), E, HID),
            "b1": jax.random.normal(next(ks), (1, HID), jnp.float32) * 0.01,
            "w2": lin(next(ks), HID, E),
            "b2": jax.random.normal(next(ks), (1, E), jnp.float32) * 0.01,
            "g2": jnp.ones((1, E), jnp.float32),
            "be2": jnp.zeros((1, E), jnp.float32),
        }
        params["blocks"].append(blk)
    return params


def lang_model_transformer(tokens, params):
    # Embedding + positional encoding (glue in plain JAX).
    x = jnp.take(params["embed"], tokens, axis=0)        # (B, S, E)
    B = tokens.shape[0]
    x = x + params["pe"][:B]                             # (B, 1, E) broadcast over seq (torch quirk)
    sims = []
    for blk in params["blocks"]:
        x, sim = encoder_block(x, blk)
        sims.append(sim)
    logits = lm_head(x.astype(jnp.bfloat16), params["w_head"], params["b_head"])
    return logits, sims


if __name__ == "__main__":
    B, S = 2, 8
    VOCAB, E, H, HID, NB = 128, 32, 4, 64, 2

    key = jax.random.PRNGKey(0)
    k_par, k_tok = jax.random.split(key)
    params = init_params(k_par, VOCAB, E, H, HID, NB)
    tokens = jax.random.randint(k_tok, (B, S), 0, VOCAB, dtype=jnp.int32)

    logits, sims = lang_model_transformer(tokens, params)
    jax.block_until_ready((logits, sims))

    assert logits.shape == (B, S, VOCAB)
    assert len(sims) == NB and sims[0].shape == (B, S, S * H)
    assert bool(jnp.all(jnp.isfinite(logits)))
    assert bool(jnp.all(jnp.isfinite(sims[0])))
    print("KERNEL_OK")
</pallas_src>

<mosaic_0001>
module attributes {stable_mosaic.version = 11 : i64} {
  func.func @_probe_copy_kernel(%arg0: i32, %arg1: memref<8x128xf32, #tpu.memory_space<vmem>>, %arg2: memref<8x128xf32, #tpu.memory_space<vmem>>) attributes {dimension_semantics = [#tpu.dimension_semantics<arbitrary>], iteration_bounds = array<i64: 1>, scalar_prefetch = 0 : i64, scratch_operands = 0 : i64, tpu.core_type = #tpu.core_type<tc>, window_params = [{pipeline_mode = #tpu.pipeline_mode<synchronous>, transform_indices = @transform_0, window_bounds = array<i64: 8, 128>}, {pipeline_mode = #tpu.pipeline_mode<synchronous>, transform_indices = @transform_1, window_bounds = array<i64: 8, 128>}]} {
    %c0 = arith.constant 0 : index
    %c0_0 = arith.constant 0 : index
    %0 = vector.load %arg1[%c0, %c0_0] : memref<8x128xf32, #tpu.memory_space<vmem>>, vector<8x128xf32>
    %c0_1 = arith.constant 0 : index
    %c0_2 = arith.constant 0 : index
    %1 = vector.load %arg2[%c0_1, %c0_2] : memref<8x128xf32, #tpu.memory_space<vmem>>, vector<8x128xf32>
    tpu.vector_store %arg2[%c0_1, %c0_2], %0 {strides = array<i32>} : memref<8x128xf32, #tpu.memory_space<vmem>>, vector<8x128xf32>,
    return
  }
  func.func @transform_0(%arg0: i32) -> (i32, i32) {
    %c0_i32 = arith.constant 0 : i32
    %c0_i32_0 = arith.constant 0 : i32
    %c0_i32_1 = arith.constant 0 : i32
    return %c0_i32, %c0_i32_0 : i32, i32
  }
  func.func @transform_1(%arg0: i32) -> (i32, i32) {
    %c0_i32 = arith.constant 0 : i32
    %c0_i32_0 = arith.constant 0 : i32
    %c0_i32_1 = arith.constant 0 : i32
    return %c0_i32, %c0_i32_0 : i32, i32
  }
}

module attributes {stable_mosaic.version = 11 : i64} {
  func.func @encoder_block_kernel(%arg0: i32, %arg1: i32, %arg2: memref<1x8x32xf32, #tpu.memory_space<vmem>>, %arg3: memref<1x8x32xbf16, #tpu.memory_space<vmem>>, %arg4: memref<32x32xbf16, #tpu.memory_space<vmem>>, %arg5: memref<32x64xbf16, #tpu.memory_space<vmem>>, %arg6: memref<32x32xbf16, #tpu.memory_space<vmem>>, %arg7: memref<1x32xf32, #tpu.memory_space<vmem>>, %arg8: memref<1x32xf32, #tpu.memory_space<vmem>>, %arg9: memref<1x32xf32, #tpu.memory_space<vmem>>, %arg10: memref<32x64xbf16, #tpu.memory_space<vmem>>, %arg11: memref<1x64xf32, #tpu.memory_space<vmem>>, %arg12: memref<64x32xbf16, #tpu.memory_space<vmem>>, %arg13: memref<1x32xf32, #tpu.memory_space<vmem>>, %arg14: memref<1x32xf32, #tpu.memory_space<vmem>>, %arg15: memref<1x32xf32, #tpu.memory_space<vmem>>, %arg16: memref<1x8x32xf32, #tpu.memory_space<vmem>>, %arg17: memref<1x8x32xf32, #tpu.memory_space<vmem>>, %arg18: memref<8x64xbf16, #tpu.memory_space<vmem>>, %arg19: memref<8x32xbf16, #tpu.memory_space<vmem>>) attributes {dimension_semantics = [#tpu.dimension_semantics<parallel>, #tpu.dimension_semantics<arbitrary>], iteration_bounds = array<i64: 2, 1>, scalar_prefetch = 0 : i64, scratch_operands = 2 : i64, tpu.core_type = #tpu.core_type<tc>, window_params = [{transform_indices = @transform_0, window_bounds = array<i64: 1, 8, 32>}, {transform_indices = @transform_1, window_bounds = array<i64: 1, 8, 32>}, {pipeline_mode = #tpu.pipeline_mode<synchronous>, transform_indices = @transform_2, window_bounds = array<i64: 32, 32>}, {pipeline_mode = #tpu.pipeline_mode<synchronous>, transform_indices = @transform_3, window_bounds = array<i64: 32, 64>}, {pipeline_mode = #tpu.pipeline_mode<synchronous>, transform_indices = @transform_4, window_bounds = array<i64: 32, 32>}, {pipeline_mode = #tpu.pipeline_mode<synchronous>, transform_indices = @transform_5, window_bounds = array<i64: 1, 32>}, {pipeline_mode = #tpu.pipeline_mode<synchronous>, transform_indices = @transform_6, window_bounds = array<i64: 1, 32>}, {pipeline_mode = #tpu.pipeline_mode<synchronous>, transform_indices = @transform_7, window_bounds = array<i64: 1, 32>}, {pipeline_mode = #tpu.pipeline_mode<synchronous>, transform_indices = @transform_8, window_bounds = array<i64: 32, 64>}, {pipeline_mode = #tpu.pipeline_mode<synchronous>, transform_indices = @transform_9, window_bounds = array<i64: 1, 64>}, {pipeline_mode = #tpu.pipeline_mode<synchronous>, transform_indices = @transform_10, window_bounds = array<i64: 64, 32>}, {pipeline_mode = #tpu.pipeline_mode<synchronous>, transform_indices = @transform_11, window_bounds = array<i64: 1, 32>}, {pipeline_mode = #tpu.pipeline_mode<synchronous>, transform_indices = @transform_12, window_bounds = array<i64: 1, 32>}, {pipeline_mode = #tpu.pipeline_mode<synchronous>, transform_indices = @transform_13, window_bounds = array<i64: 1, 32>}, {transform_indices = @transform_14, window_bounds = array<i64: 1, 8, 32>}, {transform_indices = @transform_15, window_bounds = array<i64: 1, 8, 32>}]} {
    %c0_i32 = arith.constant 0 : i32
    %0 = arith.cmpi eq, %arg1, %c0_i32 : i32
    %1 = arith.extui %0 : i1 to i32
    %c0_i32_0 = arith.constant 0 : i32
    %2 = arith.cmpi ne, %1, %c0_i32_0 : i32
    scf.if %2 {
      %c0_108 = arith.constant 0 : index
      %c0_109 = arith.constant 0 : index
      %c0_110 = arith.constant 0 : index
      %213 = vector.load %arg3[%c0_108, %c0_109, %c0_110] : memref<1x8x32xbf16, #tpu.memory_space<vmem>>, vector<1x8x32xbf16>
      %214 = vector.shape_cast %213 : vector<1x8x32xbf16> to vector<8x32xbf16>
      %c0_111 = arith.constant 0 : index
      %c0_112 = arith.constant 0 : index
      %215 = vector.load %arg5[%c0_111, %c0_112] : memref<32x64xbf16, #tpu.memory_space<vmem>>, vector<32x64xbf16>
      %cst_113 = arith.constant dense<0.000000e+00> : vector<8x64xf32>
      %216 = tpu.matmul %214, %215, %cst_113 {dimension_numbers = #tpu.dot_dimension_numbers<[1], [0], [0], [1], [0, 0, 1, 1], [], []>} : vector<8x32xbf16>, vector<32x64xbf16>, vector<8x64xf32> -> vector<8x64xf32>
      %217 = arith.truncf %216 : vector<8x64xf32> to vector<8x64xbf16>
      %c0_114 = arith.constant 0 : index
      %c0_115 = arith.constant 0 : index
      %218 = vector.load %arg18[%c0_114, %c0_115] : memref<8x64xbf16, #tpu.memory_space<vmem>>, vector<8x64xbf16>
      tpu.vector_store %arg18[%c0_114, %c0_115], %217 {strides = array<i32>} : memref<8x64xbf16, #tpu.memory_space<vmem>>, vector<8x64xbf16>,
    } else {
    }
    %c0 = arith.constant 0 : index
    %c0_1 = arith.constant 0 : index
    %c0_2 = arith.constant 0 : index
    %3 = vector.load %arg2[%c0, %c0_1, %c0_2] : memref<1x8x32xf32, #tpu.memory_space<vmem>>, vector<1x8x32xf32>
    %4 = vector.shape_cast %3 : vector<1x8x32xf32> to vector<8x32xf32>
    %5 = arith.truncf %4 : vector<8x32xf32> to vector<8x32xbf16>
    %c0_3 = arith.constant 0 : index
    %c0_4 = arith.constant 0 : index
    %6 = vector.load %arg4[%c0_3, %c0_4] : memref<32x32xbf16, #tpu.memory_space<vmem>>, vector<32x32xbf16>
    %cst = arith.constant dense<0.000000e+00> : vector<8x32xf32>
    %7 = tpu.matmul %5, %6, %cst {dimension_numbers = #tpu.dot_dimension_numbers<[1], [0], [0], [1], [0, 0, 1, 1], [], []>} : vector<8x32xbf16>, vector<32x32xbf16>, vector<8x32xf32> -> vector<8x32xf32>
    %8 = vector.extract_strided_slice %7 {offsets = [0, 0], sizes = [8, 8], strides = [1, 1]} : vector<8x32xf32> to vector<8x8xf32>
    %9 = arith.truncf %8 : vector<8x8xf32> to vector<8x8xbf16>
    %c0_5 = arith.constant 0 : index
    %c0_6 = arith.constant 0 : index
    %10 = vector.load %arg18[%c0_5, %c0_6] : memref<8x64xbf16, #tpu.memory_space<vmem>>, vector<8x8xbf16>
    %c0_7 = arith.constant 0 : index
    %c32 = arith.constant 32 : index
    %11 = vector.load %arg18[%c0_7, %c32] : memref<8x64xbf16, #tpu.memory_space<vmem>>, vector<8x8xbf16>
    %cst_8 = arith.constant dense<0.000000e+00> : vector<8x8xf32>
    %12 = tpu.matmul %9, %10, %cst_8 {dimension_numbers = #tpu.dot_dimension_numbers<[1], [1], [0], [0], [0, 0, 1, 0], [], []>} : vector<8x8xbf16>, vector<8x8xbf16>, vector<8x8xf32> -> vector<8x8xf32>
    %cst_9 = arith.constant dense<0xFF800000> : vector<8xf32>
    %13 = vector.multi_reduction <maximumf>, %12, %cst_9 [1] : vector<8x8xf32> to vector<8xf32>
    %14 = vector.shape_cast %13 : vector<8xf32> to vector<8x1xf32>
    %15 = vector.broadcast %14 : vector<8x1xf32> to vector<8x8xf32>
    %16 = arith.subf %12, %15 : vector<8x8xf32>
    %17 = math.exp %16 : vector<8x8xf32>
    %cst_10 = arith.constant dense<0.000000e+00> : vector<8xf32>
    %18 = vector.multi_reduction <add>, %17, %cst_10 [1] : vector<8x8xf32> to vector<8xf32>
    %19 = vector.shape_cast %18 : vector<8xf32> to vector<8x1xf32>
    %cst_11 = arith.constant 1.000000e+00 : f32
    %20 = vector.broadcast %cst_11 : f32 to vector<8x1xf32>
    %21 = arith.divf %20, %19 : vector<8x1xf32>
    %22 = vector.broadcast %21 : vector<8x1xf32> to vector<8x8xf32>
    %23 = arith.mulf %17, %22 : vector<8x8xf32>
    %c0_12 = arith.constant 0 : index
    %c0_13 = arith.constant 0 : index
    %c0_14 = arith.constant 0 : index
    %24 = vector.load %arg17[%c0_12, %c0_13, %c0_14] : memref<1x8x32xf32, #tpu.memory_space<vmem>>, vector<1x8x8xf32>
    %25 = vector.shape_cast %24 : vector<1x8x8xf32> to vector<8x8xf32>
    %26 = vector.shape_cast %23 : vector<8x8xf32> to vector<1x8x8xf32>
    tpu.vector_store %arg17[%c0_12, %c0_13, %c0_14], %26 {strides = array<i32>} : memref<1x8x32xf32, #tpu.memory_space<vmem>>, vector<1x8x8xf32>,
    %27 = arith.truncf %23 : vector<8x8xf32> to vector<8x8xbf16>
    %cst_15 = arith.constant dense<0.000000e+00> : vector<8x8xf32>
    %28 = tpu.matmul %27, %11, %cst_15 {dimension_numbers = #tpu.dot_dimension_numbers<[1], [0], [0], [1], [0, 0, 1, 1], [], []>} : vector<8x8xbf16>, vector<8x8xbf16>, vector<8x8xf32> -> vector<8x8xf32>
    %29 = arith.truncf %28 : vector<8x8xf32> to vector<8x8xbf16>
    %c0_16 = arith.constant 0 : index
    %c0_17 = arith.constant 0 : index
    %30 = vector.load %arg19[%c0_16, %c0_17] : memref<8x32xbf16, #tpu.memory_space<vmem>>, vector<8x8xbf16>
    tpu.vector_store %arg19[%c0_16, %c0_17], %29 {strides = array<i32>} : memref<8x32xbf16, #tpu.memory_space<vmem>>, vector<8x8xbf16>,
    %31 = vector.extract_strided_slice %7 {offsets = [0, 8], sizes = [8, 8], strides = [1, 1]} : vector<8x32xf32> to vector<8x8xf32>
    %32 = arith.truncf %31 : vector<8x8xf32> to vector<8x8xbf16>
    %c0_18 = arith.constant 0 : index
    %c8 = arith.constant 8 : index
    %33 = vector.load %arg18[%c0_18, %c8] : memref<8x64xbf16, #tpu.memory_space<vmem>>, vector<8x8xbf16>
    %c0_19 = arith.constant 0 : index
    %c40 = arith.constant 40 : index
    %34 = vector.load %arg18[%c0_19, %c40] : memref<8x64xbf16, #tpu.memory_space<vmem>>, vector<8x8xbf16>
    %cst_20 = arith.constant dense<0.000000e+00> : vector<8x8xf32>
    %35 = tpu.matmul %32, %33, %cst_20 {dimension_numbers = #tpu.dot_dimension_numbers<[1], [1], [0], [0], [0, 0, 1, 0], [], []>} : vector<8x8xbf16>, vector<8x8xbf16>, vector<8x8xf32> -> vector<8x8xf32>
    %cst_21 = arith.constant dense<0xFF800000> : vector<8xf32>
    %36 = vector.multi_reduction <maximumf>, %35, %cst_21 [1] : vector<8x8xf32> to vector<8xf32>
    %37 = vector.shape_cast %36 : vector<8xf32> to vector<8x1xf32>
    %38 = vector.broadcast %37 : vector<8x1xf32> to vector<8x8xf32>
    %39 = arith.subf %35, %38 : vector<8x8xf32>
    %40 = math.exp %39 : vector<8x8xf32>
    %cst_22 = arith.constant dense<0.000000e+00> : vector<8xf32>
    %41 = vector.multi_reduction <add>, %40, %cst_22 [1] : vector<8x8xf32> to vector<8xf32>
    %42 = vector.shape_cast %41 : vector<8xf32> to vector<8x1xf32>
    %cst_23 = arith.constant 1.000000e+00 : f32
    %43 = vector.broadcast %cst_23 : f32 to vector<8x1xf32>
    %44 = arith.divf %43, %42 : vector<8x1xf32>
    %45 = vector.broadcast %44 : vector<8x1xf32> to vector<8x8xf32>
    %46 = arith.mulf %40, %45 : vector<8x8xf32>
    %c0_24 = arith.constant 0 : index
    %c0_25 = arith.constant 0 : index
    %c8_26 = arith.constant 8 : index
    %47 = vector.load %arg17[%c0_24, %c0_25, %c8_26] : memref<1x8x32xf32, #tpu.memory_space<vmem>>, vector<1x8x8xf32>
    %48 = vector.shape_cast %47 : vector<1x8x8xf32> to vector<8x8xf32>
    %49 = vector.shape_cast %46 : vector<8x8xf32> to vector<1x8x8xf32>
    tpu.vector_store %arg17[%c0_24, %c0_25, %c8_26], %49 {strides = array<i32>} : memref<1x8x32xf32, #tpu.memory_space<vmem>>, vector<1x8x8xf32>,
    %50 = arith.truncf %46 : vector<8x8xf32> to vector<8x8xbf16>
    %cst_27 = arith.constant dense<0.000000e+00> : vector<8x8xf32>
    %51 = tpu.matmul %50, %34, %cst_27 {dimension_numbers = #tpu.dot_dimension_numbers<[1], [0], [0], [1], [0, 0, 1, 1], [], []>} : vector<8x8xbf16>, vector<8x8xbf16>, vector<8x8xf32> -> vector<8x8xf32>
    %52 = arith.truncf %51 : vector<8x8xf32> to vector<8x8xbf16>
    %c0_28 = arith.constant 0 : index
    %c8_29 = arith.constant 8 : index
    %53 = vector.load %arg19[%c0_28, %c8_29] : memref<8x32xbf16, #tpu.memory_space<vmem>>, vector<8x8xbf16>
    tpu.vector_store %arg19[%c0_28, %c8_29], %52 {strides = array<i32>} : memref<8x32xbf16, #tpu.memory_space<vmem>>, vector<8x8xbf16>,
    %54 = vector.extract_strided_slice %7 {offsets = [0, 16], sizes = [8, 8], strides = [1, 1]} : vector<8x32xf32> to vector<8x8xf32>
    %55 = arith.truncf %54 : vector<8x8xf32> to vector<8x8xbf16>
    %c0_30 = arith.constant 0 : index
    %c16 = arith.constant 16 : index
    %56 = vector.load %arg18[%c0_30, %c16] : memref<8x64xbf16, #tpu.memory_space<vmem>>, vector<8x8xbf16>
    %c0_31 = arith.constant 0 : index
    %c48 = arith.constant 48 : index
    %57 = vector.load %arg18[%c0_31, %c48] : memref<8x64xbf16, #tpu.memory_space<vmem>>, vector<8x8xbf16>
    %cst_32 = arith.constant dense<0.000000e+00> : vector<8x8xf32>
    %58 = tpu.matmul %55, %56, %cst_32 {dimension_numbers = #tpu.dot_dimension_numbers<[1], [1], [0], [0], [0, 0, 1, 0], [], []>} : vector<8x8xbf16>, vector<8x8xbf16>, vector<8x8xf32> -> vector<8x8xf32>
    %cst_33 = arith.constant dense<0xFF800000> : vector<8xf32>
    %59 = vector.multi_reduction <maximumf>, %58, %cst_33 [1] : vector<8x8xf32> to vector<8xf32>
    %60 = vector.shape_cast %59 : vector<8xf32> to vector<8x1xf32>
    %61 = vector.broadcast %60 : vector<8x1xf32> to vector<8x8xf32>
    %62 = arith.subf %58, %61 : vector<8x8xf32>
    %63 = math.exp %62 : vector<8x8xf32>
    %cst_34 = arith.constant dense<0.000000e+00> : vector<8xf32>
    %64 = vector.multi_reduction <add>, %63, %cst_34 [1] : vector<8x8xf32> to vector<8xf32>
    %65 = vector.shape_cast %64 : vector<8xf32> to vector<8x1xf32>
    %cst_35 = arith.constant 1.000000e+00 : f32
    %66 = vector.broadcast %cst_35 : f32 to vector<8x1xf32>
    %67 = arith.divf %66, %65 : vector<8x1xf32>
    %68 = vector.broadcast %67 : vector<8x1xf32> to vector<8x8xf32>
    %69 = arith.mulf %63, %68 : vector<8x8xf32>
    %c0_36 = arith.constant 0 : index
    %c0_37 = arith.constant 0 : index
    %c16_38 = arith.constant 16 : index
    %70 = vector.load %arg17[%c0_36, %c0_37, %c16_38] : memref<1x8x32xf32, #tpu.memory_space<vmem>>, vector<1x8x8xf32>
    %71 = vector.shape_cast %70 : vector<1x8x8xf32> to vector<8x8xf32>
    %72 = vector.shape_cast %69 : vector<8x8xf32> to vector<1x8x8xf32>
    tpu.vector_store %arg17[%c0_36, %c0_37, %c16_38], %72 {strides = array<i32>} : memref<1x8x32xf32, #tpu.memory_space<vmem>>, vector<1x8x8xf32>,
    %73 = arith.truncf %69 : vector<8x8xf32> to vector<8x8xbf16>
    %cst_39 = arith.constant dense<0.000000e+00> : vector<8x8xf32>
    %74 = tpu.matmul %73, %57, %cst_39 {dimension_numbers = #tpu.dot_dimension_numbers<[1], [0], [0], [1], [0, 0, 1, 1], [], []>} : vector<8x8xbf16>, vector<8x8xbf16>, vector<8x8xf32> -> vector<8x8xf32>
    %75 = arith.truncf %74 : vector<8x8xf32> to vector<8x8xbf16>
    %c0_40 = arith.constant 0 : index
    %c16_41 = arith.constant 16 : index
    %76 = vector.load %arg19[%c0_40, %c16_41] : memref<8x32xbf16, #tpu.memory_space<vmem>>, vector<8x8xbf16>
    tpu.vector_store %arg19[%c0_40, %c16_41], %75 {strides = array<i32>} : memref<8x32xbf16, #tpu.memory_space<vmem>>, vector<8x8xbf16>,
    %77 = vector.extract_strided_slice %7 {offsets = [0, 24], sizes = [8, 8], strides = [1, 1]} : vector<8x32xf32> to vector<8x8xf32>
    %78 = arith.truncf %77 : vector<8x8xf32> to vector<8x8xbf16>
    %c0_42 = arith.constant 0 : index
    %c24 = arith.constant 24 : index
    %79 = vector.load %arg18[%c0_42, %c24] : memref<8x64xbf16, #tpu.memory_space<vmem>>, vector<8x8xbf16>
    %c0_43 = arith.constant 0 : index
    %c56 = arith.constant 56 : index
    %80 = vector.load %arg18[%c0_43, %c56] : memref<8x64xbf16, #tpu.memory_space<vmem>>, vector<8x8xbf16>
    %cst_44 = arith.constant dense<0.000000e+00> : vector<8x8xf32>
    %81 = tpu.matmul %78, %79, %cst_44 {dimension_numbers = #tpu.dot_dimension_numbers<[1], [1], [0], [0], [0, 0, 1, 0], [], []>} : vector<8x8xbf16>, vector<8x8xbf16>, vector<8x8xf32> -> vector<8x8xf32>
    %cst_45 = arith.constant dense<0xFF800000> : vector<8xf32>
    %82 = vector.multi_reduction <maximumf>, %81, %cst_45 [1] : vector<8x8xf32> to vector<8xf32>
    %83 = vector.shape_cast %82 : vector<8xf32> to vector<8x1xf32>
    %84 = vector.broadcast %83 : vector<8x1xf32> to vector<8x8xf32>
    %85 = arith.subf %81, %84 : vector<8x8xf32>
    %86 = math.exp %85 : vector<8x8xf32>
    %cst_46 = arith.constant dense<0.000000e+00> : vector<8xf32>
    %87 = vector.multi_reduction <add>, %86, %cst_46 [1] : vector<8x8xf32> to vector<8xf32>
    %88 = vector.shape_cast %87 : vector<8xf32> to vector<8x1xf32>
    %cst_47 = arith.constant 1.000000e+00 : f32
    %89 = vector.broadcast %cst_47 : f32 to vector<8x1xf32>
    %90 = arith.divf %89, %88 : vector<8x1xf32>
    %91 = vector.broadcast %90 : vector<8x1xf32> to vector<8x8xf32>
    %92 = arith.mulf %86, %91 : vector<8x8xf32>
    %c0_48 = arith.constant 0 : index
    %c0_49 = arith.constant 0 : index
    %c24_50 = arith.constant 24 : index
    %93 = vector.load %arg17[%c0_48, %c0_49, %c24_50] : memref<1x8x32xf32, #tpu.memory_space<vmem>>, vector<1x8x8xf32>
    %94 = vector.shape_cast %93 : vector<1x8x8xf32> to vector<8x8xf32>
    %95 = vector.shape_cast %92 : vector<8x8xf32> to vector<1x8x8xf32>
    tpu.vector_store %arg17[%c0_48, %c0_49, %c24_50], %95 {strides = array<i32>} : memref<1x8x32xf32, #tpu.memory_space<vmem>>, vector<1x8x8xf32>,
    %96 = arith.truncf %92 : vector<8x8xf32> to vector<8x8xbf16>
    %cst_51 = arith.constant dense<0.000000e+00> : vector<8x8xf32>
    %97 = tpu.matmul %96, %80, %cst_51 {dimension_numbers = #tpu.dot_dimension_numbers<[1], [0], [0], [1], [0, 0, 1, 1], [], []>} : vector<8x8xbf16>, vector<8x8xbf16>, vector<8x8xf32> -> vector<8x8xf32>
    %98 = arith.truncf %97 : vector<8x8xf32> to vector<8x8xbf16>
    %c0_52 = arith.constant 0 : index
    %c24_53 = arith.constant 24 : index
    %99 = vector.load %arg19[%c0_52, %c24_53] : memref<8x32xbf16, #tpu.memory_space<vmem>>, vector<8x8xbf16>
    tpu.vector_store %arg19[%c0_52, %c24_53], %98 {strides = array<i32>} : memref<8x32xbf16, #tpu.memory_space<vmem>>, vector<8x8xbf16>,
    %c0_54 = arith.constant 0 : index
    %c0_55 = arith.constant 0 : index
    %100 = vector.load %arg19[%c0_54, %c0_55] : memref<8x32xbf16, #tpu.memory_space<vmem>>, vector<8x32xbf16>
    %c0_56 = arith.constant 0 : index
    %c0_57 = arith.constant 0 : index
    %101 = vector.load %arg6[%c0_56, %c0_57] : memref<32x32xbf16, #tpu.memory_space<vmem>>, vector<32x32xbf16>
    %cst_58 = arith.constant dense<0.000000e+00> : vector<8x32xf32>
    %102 = tpu.matmul %100, %101, %cst_58 {dimension_numbers = #tpu.dot_dimension_numbers<[1], [0], [0], [1], [0, 0, 1, 1], [], []>} : vector<8x32xbf16>, vector<32x32xbf16>, vector<8x32xf32> -> vector<8x32xf32>
    %c0_59 = arith.constant 0 : index
    %c0_60 = arith.constant 0 : index
    %103 = vector.load %arg7[%c0_59, %c0_60] : memref<1x32xf32, #tpu.memory_space<vmem>>, vector<1x32xf32>
    %104 = vector.broadcast %103 : vector<1x32xf32> to vector<8x32xf32>
    %105 = arith.addf %102, %104 : vector<8x32xf32>
    %cst_61 = arith.constant 0.000000e+00 : f32
    %106 = vector.broadcast %cst_61 : f32 to vector<8x32xf32>
    %107 = arith.maximumf %105, %106 : vector<8x32xf32>
    %108 = arith.addf %4, %107 : vector<8x32xf32>
    %c0_62 = arith.constant 0 : index
    %c0_63 = arith.constant 0 : index
    %109 = vector.load %arg8[%c0_62, %c0_63] : memref<1x32xf32, #tpu.memory_space<vmem>>, vector<1x32xf32>
    %c0_64 = arith.constant 0 : index
    %c0_65 = arith.constant 0 : index
    %110 = vector.load %arg9[%c0_64, %c0_65] : memref<1x32xf32, #tpu.memory_space<vmem>>, vector<1x32xf32>
    %cst_66 = arith.constant dense<0.000000e+00> : vector<8xf32>
    %111 = vector.multi_reduction <add>, %108, %cst_66 [1] : vector<8x32xf32> to vector<8xf32>
    %112 = vector.shape_cast %111 : vector<8xf32> to vector<8x1xf32>
    %cst_67 = arith.constant 3.200000e+01 : f32
    %113 = vector.broadcast %cst_67 : f32 to vector<8x1xf32>
    %114 = arith.divf %112, %113 : vector<8x1xf32>
    %115 = vector.broadcast %114 : vector<8x1xf32> to vector<8x32xf32>
    %116 = arith.subf %108, %115 : vector<8x32xf32>
    %117 = arith.mulf %116, %116 : vector<8x32xf32>
    %cst_68 = arith.constant dense<0.000000e+00> : vector<8xf32>
    %118 = vector.multi_reduction <add>, %117, %cst_68 [1] : vector<8x32xf32> to vector<8xf32>
    %119 = vector.shape_cast %118 : vector<8xf32> to vector<8x1xf32>
    %cst_69 = arith.constant 3.200000e+01 : f32
    %120 = vector.broadcast %cst_69 : f32 to vector<8x1xf32>
    %121 = arith.divf %119, %120 : vector<8x1xf32>
    %122 = vector.broadcast %114 : vector<8x1xf32> to vector<8x32xf32>
    %123 = arith.subf %108, %122 : vector<8x32xf32>
    %cst_70 = arith.constant 9.99999974E-6 : f32
    %124 = vector.broadcast %cst_70 : f32 to vector<8x1xf32>
    %125 = arith.addf %121, %124 : vector<8x1xf32>
    %126 = math.rsqrt %125 : vector<8x1xf32>
    %127 = vector.broadcast %126 : vector<8x1xf32> to vector<8x32xf32>
    %128 = arith.mulf %123, %127 : vector<8x32xf32>
    %129 = vector.broadcast %109 : vector<1x32xf32> to vector<8x32xf32>
    %130 = arith.mulf %128, %129 : vector<8x32xf32>
    %131 = vector.broadcast %110 : vector<1x32xf32> to vector<8x32xf32>
    %132 = arith.addf %130, %131 : vector<8x32xf32>
    %133 = arith.truncf %132 : vector<8x32xf32> to vector<8x32xbf16>
    %c0_71 = arith.constant 0 : index
    %c0_72 = arith.constant 0 : index
    %134 = vector.load %arg10[%c0_71, %c0_72] : memref<32x64xbf16, #tpu.memory_space<vmem>>, vector<32x64xbf16>
    %cst_73 = arith.constant dense<0.000000e+00> : vector<8x64xf32>
    %135 = tpu.matmul %133, %134, %cst_73 {dimension_numbers = #tpu.dot_dimension_numbers<[1], [0], [0], [1], [0, 0, 1, 1], [], []>} : vector<8x32xbf16>, vector<32x64xbf16>, vector<8x64xf32> -> vector<8x64xf32>
    %c0_74 = arith.constant 0 : index
    %c0_75 = arith.constant 0 : index
    %136 = vector.load %arg11[%c0_74, %c0_75] : memref<1x64xf32, #tpu.memory_space<vmem>>, vector<1x64xf32>
    %137 = vector.broadcast %136 : vector<1x64xf32> to vector<8x64xf32>
    %138 = arith.addf %135, %137 : vector<8x64xf32>
    %cst_76 = arith.constant 5.000000e-01 : f32
    %139 = vector.broadcast %cst_76 : f32 to vector<8x64xf32>
    %140 = arith.mulf %139, %138 : vector<8x64xf32>
    %cst_77 = arith.constant 0.707106769 : f32
    %141 = vector.broadcast %cst_77 : f32 to vector<8x64xf32>
    %142 = arith.mulf %138, %141 : vector<8x64xf32>
    %143 = math.absf %142 : vector<8x64xf32>
    %cst_78 = arith.constant 0.327591091 : f32
    %144 = vector.broadcast %cst_78 : f32 to vector<8x64xf32>
    %145 = arith.mulf %144, %143 : vector<8x64xf32>
    %cst_79 = arith.constant 1.000000e+00 : f32
    %146 = vector.broadcast %cst_79 : f32 to vector<8x64xf32>
    %147 = arith.addf %146, %145 : vector<8x64xf32>
    %cst_80 = arith.constant 1.000000e+00 : f32
    %148 = vector.broadcast %cst_80 : f32 to vector<8x64xf32>
    %149 = arith.divf %148, %147 : vector<8x64xf32>
    %cst_81 = arith.constant 1.06140542 : f32
    %150 = vector.broadcast %cst_81 : f32 to vector<8x64xf32>
    %151 = arith.mulf %150, %149 : vector<8x64xf32>
    %cst_82 = arith.constant -1.45315206 : f32
    %152 = vector.broadcast %cst_82 : f32 to vector<8x64xf32>
    %153 = arith.addf %151, %152 : vector<8x64xf32>
    %154 = arith.mulf %153, %149 : vector<8x64xf32>
    %cst_83 = arith.constant 1.42141378 : f32
    %155 = vector.broadcast %cst_83 : f32 to vector<8x64xf32>
    %156 = arith.addf %154, %155 : vector<8x64xf32>
    %157 = arith.mulf %156, %149 : vector<8x64xf32>
    %cst_84 = arith.constant -0.284496725 : f32
    %158 = vector.broadcast %cst_84 : f32 to vector<8x64xf32>
    %159 = arith.addf %157, %158 : vector<8x64xf32>
    %160 = arith.mulf %159, %149 : vector<8x64xf32>
    %cst_85 = arith.constant 0.254829586 : f32
    %161 = vector.broadcast %cst_85 : f32 to vector<8x64xf32>
    %162 = arith.addf %160, %161 : vector<8x64xf32>
    %163 = arith.mulf %162, %149 : vector<8x64xf32>
    %cst_86 = arith.constant 0.000000e+00 : f32
    %164 = vector.broadcast %cst_86 : f32 to vector<8x64xf32>
    %165 = arith.subf %164, %143 : vector<8x64xf32>
    %166 = arith.mulf %165, %143 : vector<8x64xf32>
    %167 = math.exp %166 : vector<8x64xf32>
    %168 = arith.mulf %163, %167 : vector<8x64xf32>
    %cst_87 = arith.constant 1.000000e+00 : f32
    %169 = vector.broadcast %cst_87 : f32 to vector<8x64xf32>
    %170 = arith.subf %169, %168 : vector<8x64xf32>
    %cst_88 = arith.constant 0.000000e+00 : f32
    %171 = vector.broadcast %cst_88 : f32 to vector<8x64xf32>
    %172 = arith.cmpf oge, %142, %171 : vector<8x64xf32>
    %cst_89 = arith.constant 0.000000e+00 : f32
    %173 = vector.broadcast %cst_89 : f32 to vector<8x64xf32>
    %174 = arith.subf %173, %170 : vector<8x64xf32>
    %175 = arith.select %172, %170, %174 : vector<8x64xi1>, vector<8x64xf32>
    %cst_90 = arith.constant 1.000000e+00 : f32
    %176 = vector.broadcast %cst_90 : f32 to vector<8x64xf32>
    %177 = arith.addf %176, %175 : vector<8x64xf32>
    %178 = arith.mulf %140, %177 : vector<8x64xf32>
    %179 = arith.truncf %178 : vector<8x64xf32> to vector<8x64xbf16>
    %c0_91 = arith.constant 0 : index
    %c0_92 = arith.constant 0 : index
    %180 = vector.load %arg12[%c0_91, %c0_92] : memref<64x32xbf16, #tpu.memory_space<vmem>>, vector<64x32xbf16>
    %cst_93 = arith.constant dense<0.000000e+00> : vector<8x32xf32>
    %181 = tpu.matmul %179, %180, %cst_93 {dimension_numbers = #tpu.dot_dimension_numbers<[1], [0], [0], [1], [0, 0, 1, 1], [], []>} : vector<8x64xbf16>, vector<64x32xbf16>, vector<8x32xf32> -> vector<8x32xf32>
    %c0_94 = arith.constant 0 : index
    %c0_95 = arith.constant 0 : index
    %182 = vector.load %arg13[%c0_94, %c0_95] : memref<1x32xf32, #tpu.memory_space<vmem>>, vector<1x32xf32>
    %183 = vector.broadcast %182 : vector<1x32xf32> to vector<8x32xf32>
    %184 = arith.addf %181, %183 : vector<8x32xf32>
    %185 = arith.addf %132, %184 : vector<8x32xf32>
    %c0_96 = arith.constant 0 : index
    %c0_97 = arith.constant 0 : index
    %186 = vector.load %arg14[%c0_96, %c0_97] : memref<1x32xf32, #tpu.memory_space<vmem>>, vector<1x32xf32>
    %c0_98 = arith.constant 0 : index
    %c0_99 = arith.constant 0 : index
    %187 = vector.load %arg15[%c0_98, %c0_99] : memref<1x32xf32, #tpu.memory_space<vmem>>, vector<1x32xf32>
    %cst_100 = arith.constant dense<0.000000e+00> : vector<8xf32>
    %188 = vector.multi_reduction <add>, %185, %cst_100 [1] : vector<8x32xf32> to vector<8xf32>
    %189 = vector.shape_cast %188 : vector<8xf32> to vector<8x1xf32>
    %cst_101 = arith.constant 3.200000e+01 : f32
    %190 = vector.broadcast %cst_101 : f32 to vector<8x1xf32>
    %191 = arith.divf %189, %190 : vector<8x1xf32>
    %192 = vector.broadcast %191 : vector<8x1xf32> to vector<8x32xf32>
    %193 = arith.subf %185, %192 : vector<8x32xf32>
    %194 = arith.mulf %193, %193 : vector<8x32xf32>
    %cst_102 = arith.constant dense<0.000000e+00> : vector<8xf32>
    %195 = vector.multi_reduction <add>, %194, %cst_102 [1] : vector<8x32xf32> to vector<8xf32>
    %196 = vector.shape_cast %195 : vector<8xf32> to vector<8x1xf32>
    %cst_103 = arith.constant 3.200000e+01 : f32
    %197 = vector.broadcast %cst_103 : f32 to vector<8x1xf32>
    %198 = arith.divf %196, %197 : vector<8x1xf32>
    %199 = vector.broadcast %191 : vector<8x1xf32> to vector<8x32xf32>
    %200 = arith.subf %185, %199 : vector<8x32xf32>
    %cst_104 = arith.constant 9.99999974E-6 : f32
    %201 = vector.broadcast %cst_104 : f32 to vector<8x1xf32>
    %202 = arith.addf %198, %201 : vector<8x1xf32>
    %203 = math.rsqrt %202 : vector<8x1xf32>
    %204 = vector.broadcast %203 : vector<8x1xf32> to vector<8x32xf32>
    %205 = arith.mulf %200, %204 : vector<8x32xf32>
    %206 = vector.broadcast %186 : vector<1x32xf32> to vector<8x32xf32>
    %207 = arith.mulf %205, %206 : vector<8x32xf32>
    %208 = vector.broadcast %187 : vector<1x32xf32> to vector<8x32xf32>
    %209 = arith.addf %207, %208 : vector<8x32xf32>
    %c0_105 = arith.constant 0 : index
    %c0_106 = arith.constant 0 : index
    %c0_107 = arith.constant 0 : index
    %210 = vector.load %arg16[%c0_105, %c0_106, %c0_107] : memref<1x8x32xf32, #tpu.memory_space<vmem>>, vector<1x8x32xf32>
    %211 = vector.shape_cast %210 : vector<1x8x32xf32> to vector<8x32xf32>
    %212 = vector.shape_cast %209 : vector<8x32xf32> to vector<1x8x32xf32>
    tpu.vector_store %arg16[%c0_105, %c0_106, %c0_107], %212 {strides = array<i32>} : memref<1x8x32xf32, #tpu.memory_space<vmem>>, vector<1x8x32xf32>,
    return
  }
  func.func @transform_0(%arg0: i32, %arg1: i32) -> (i32, i32, i32) {
    %c0_i32 = arith.constant 0 : i32
    %c0_i32_0 = arith.constant 0 : i32
    return %arg0, %arg1, %c0_i32 : i32, i32, i32
  }
  func.func @transform_1(%arg0: i32, %arg1: i32) -> (i32, i32, i32) {
    %c0_i32 = arith.constant 0 : i32
    %c0_i32_0 = arith.constant 0 : i32
    %c0_i32_1 = arith.constant 0 : i32
    return %arg0, %c0_i32, %c0_i32_0 : i32, i32, i32
  }
  func.func @transform_2(%arg0: i32, %arg1: i32) -> (i32, i32) {
    %c0_i32 = arith.constant 0 : i32
    %c0_i32_0 = arith.constant 0 : i32
    %c0_i32_1 = arith.constant 0 : i32
    return %c0_i32, %c0_i32_0 : i32, i32
  }
  func.func @transform_3(%arg0: i32, %arg1: i32) -> (i32, i32) {
    %c0_i32 = arith.constant 0 : i32
    %c0_i32_0 = arith.constant 0 : i32
    %c0_i32_1 = arith.constant 0 : i32
    return %c0_i32, %c0_i32_0 : i32, i32
  }
  func.func @transform_4(%arg0: i32, %arg1: i32) -> (i32, i32) {
    %c0_i32 = arith.constant 0 : i32
    %c0_i32_0 = arith.constant 0 : i32
    %c0_i32_1 = arith.constant 0 : i32
    return %c0_i32, %c0_i32_0 : i32, i32
  }
  func.func @transform_5(%arg0: i32, %arg1: i32) -> (i32, i32) {
    %c0_i32 = arith.constant 0 : i32
    %c0_i32_0 = arith.constant 0 : i32
    %c0_i32_1 = arith.constant 0 : i32
    return %c0_i32, %c0_i32_0 : i32, i32
  }
  func.func @transform_6(%arg0: i32, %arg1: i32) -> (i32, i32) {
    %c0_i32 = arith.constant 0 : i32
    %c0_i32_0 = arith.constant 0 : i32
    %c0_i32_1 = arith.constant 0 : i32
    return %c0_i32, %c0_i32_0 : i32, i32
  }
  func.func @transform_7(%arg0: i32, %arg1: i32) -> (i32, i32) {
    %c0_i32 = arith.constant 0 : i32
    %c0_i32_0 = arith.constant 0 : i32
    %c0_i32_1 = arith.constant 0 : i32
    return %c0_i32, %c0_i32_0 : i32, i32
  }
  func.func @transform_8(%arg0: i32, %arg1: i32) -> (i32, i32) {
    %c0_i32 = arith.constant 0 : i32
    %c0_i32_0 = arith.constant 0 : i32
    %c0_i32_1 = arith.constant 0 : i32
    return %c0_i32, %c0_i32_0 : i32, i32
  }
  func.func @transform_9(%arg0: i32, %arg1: i32) -> (i32, i32) {
    %c0_i32 = arith.constant 0 : i32
    %c0_i32_0 = arith.constant 0 : i32
    %c0_i32_1 = arith.constant 0 : i32
    return %c0_i32, %c0_i32_0 : i32, i32
  }
  func.func @transform_10(%arg0: i32, %arg1: i32) -> (i32, i32) {
    %c0_i32 = arith.constant 0 : i32
    %c0_i32_0 = arith.constant 0 : i32
    %c0_i32_1 = arith.constant 0 : i32
    return %c0_i32, %c0_i32_0 : i32, i32
  }
  func.func @transform_11(%arg0: i32, %arg1: i32) -> (i32, i32) {
    %c0_i32 = arith.constant 0 : i32
    %c0_i32_0 = arith.constant 0 : i32
    %c0_i32_1 = arith.constant 0 : i32
    return %c0_i32, %c0_i32_0 : i32, i32
  }
  func.func @transform_12(%arg0: i32, %arg1: i32) -> (i32, i32) {
    %c0_i32 = arith.constant 0 : i32
    %c0_i32_0 = arith.constant 0 : i32
    %c0_i32_1 = arith.constant 0 : i32
    return %c0_i32, %c0_i32_0 : i32, i32
  }
  func.func @transform_13(%arg0: i32, %arg1: i32) -> (i32, i32) {
    %c0_i32 = arith.constant 0 : i32
    %c0_i32_0 = arith.constant 0 : i32
    %c0_i32_1 = arith.constant 0 : i32
    return %c0_i32, %c0_i32_0 : i32, i32
  }
  func.func @transform_14(%arg0: i32, %arg1: i32) -> (i32, i32, i32) {
    %c0_i32 = arith.constant 0 : i32
    %c0_i32_0 = arith.constant 0 : i32
    return %arg0, %arg1, %c0_i32 : i32, i32, i32
  }
  func.func @transform_15(%arg0: i32, %arg1: i32) -> (i32, i32, i32) {
    %c0_i32 = arith.constant 0 : i32
    %c0_i32_0 = arith.constant 0 : i32
    return %arg0, %arg1, %c0_i32 : i32, i32, i32
  }
}

</mosaic_0001>

<bundles_post_ra>
// kernel: tpu_custom_call.1
= control target key start
LH: loop header
LB: loop body
LE: loop exit
PB: predicated region body
PF: predicated region fallthrough
CT: control target
= control target key end

     0   :  { %6 = vsyncpa [#allocation3], 0  ;;  %s124_s0 = inlined_call_operand.hbm [shape: f32[8,128], index: 0, kind: input, shape index: {}]   ;;  %s125_s1 = inlined_call_operand.hbm [shape: f32[8,128], index: 1, kind: output, shape index: {}]  }
   0x1   :  { %7 = vsyncpa [#allocation4], 0  ;;  %s88_s6 = smov [#allocation2]   ;;  %s40_s10 = scalar_lea.hbm %s124_s0, 128 }
   0x2   :  { %s14_s7 = sshll.u32 %s88_s6, 4  ;;  %p41_p0 = scmp.ne.s32.totalorder %s124_s0, %s40_s10  ;;  %s15_s7 = int_to_ptr.vmem [resolvable:$true] %s14_s7 }
   0x3   :  { %p44_p1 = scmp.lt.u32.totalorder %s40_s10, %s124_s0 }
   0x5   :  { %p46_p2 = pnand %p44_p1, %p41_p0 }
   0x7   :  { %49 = shalt.err (!%p46_p2)
}
   0x8   :  { %s50_s15 = scalar_lea.vmem %s15_s7, 128  ;;  %p55_p4 = scmp.lt.s32.totalorder %s15_s7, %s15_s7 }
   0x9   :  { %p51_p3 = scmp.ne.s32.totalorder %s15_s7, %s50_s15  ;;  %p56_p5 = scmp.lt.s32.totalorder %s50_s15, %s50_s15 }
   0xb   :  { %p57_p6 = por %p56_p5, %p55_p4 }
   0xd   :  { %p58_p7 = pnand %p57_p6, %p51_p3 }
   0xf   :  { %61 = shalt.err (!%p58_p7)
}
  0x10   :  { %17 = dma.hbm_to_vmem [thread:$0]  %s124_s0, 128, %s15_s7, [#allocation3]  }
  0x11   :  { %84 = dma.done.wait [#allocation3], 128  }
  0x12   :  { %85 = vsyncadd [#allocation3], 4294967168  ;;  %s89_s18 = smov [#allocation5]   ;;  %v21_v0 = vld [vmem:[#allocation2] sm:$0xff] }
  0x13   :  { %s29_s19 = sshll.u32 %s89_s18, 4  ;;  %22 = vst [vmem:[#allocation5] sm:$0xff] %v21_v0  ;;  %s30_s19 = int_to_ptr.vmem [resolvable:$true] %s29_s19 }
  0x14   :  { %s62_s20 = scalar_lea.vmem %s30_s19, 128  ;;  %p67_p9 = scmp.lt.s32.totalorder %s30_s19, %s30_s19 }
  0x15   :  { %p63_p8 = scmp.ne.s32.totalorder %s30_s19, %s62_s20  ;;  %p68_p10 = scmp.lt.s32.totalorder %s62_s20, %s62_s20 }
  0x17   :  { %p69_p11 = por %p68_p10, %p67_p9 }
  0x19   :  { %p70_p12 = pnand %p69_p11, %p63_p8 }
  0x1b   :  { %73 = shalt.err (!%p70_p12)
}
  0x1c   :  { %s74_s23 = scalar_lea.hbm %s125_s1, 128 }
  0x1d   :  { %p75_p13 = scmp.ne.s32.totalorder %s125_s1, %s74_s23  ;;  %p78_p0 = scmp.lt.u32.totalorder %s74_s23, %s125_s1 }
  0x1f   :  { %p80_p1 = pnand %p78_p0, %p75_p13 }
  0x21   :  { %83 = shalt.err (!%p80_p1)
}
  0x22   :  { %32 = dma.vmem_to_hbm [thread:$0]  %s30_s19, 128, %s125_s1, [#allocation4]  }
  0x23   :  { %86 = dma.done.wait [#allocation4], 128  }
  0x24   :  { %87 = vsyncadd [#allocation4], 4294967168 }
  0x25   :  { %36 = vsyncpa [#allocation3], 1 }
  0x26   :  { %37 = vsyncpa [#allocation4], 1 }

// kernel: tpu_custom_call.1
= control target key start
LH: loop header
LB: loop body
LE: loop exit
PB: predicated region body
PF: predicated region fallthrough
CT: control target
= control target key end

     0   :  { %s3759_s0 = inlined_call_operand.hbm [shape: f32[2,8,32], index: 0, kind: input, shape index: {}]   ;;  %s3760_s1 = inlined_call_operand.hbm [shape: bf16[2,8,32], index: 1, kind: input, shape index: {}]   ;;  %s3761_s2 = inlined_call_operand.hbm [shape: bf16[32,32], index: 2, kind: input, shape index: {}]   ;;  %s3762_s3 = inlined_call_operand.hbm [shape: bf16[32,64], index: 3, kind: input, shape index: {}]   ;;  %s3763_s4 = inlined_call_operand.hbm [shape: bf16[32,32], index: 4, kind: input, shape index: {}]   ;;  %s3764_s5 = inlined_call_operand.hbm [shape: f32[1,32], index: 5, kind: input, shape index: {}]   ;;  %s3765_s6 = inlined_call_operand.hbm [shape: f32[1,32], index: 6, kind: input, shape index: {}]   ;;  %s3766_s7 = inlined_call_operand.hbm [shape: f32[1,32], index: 7, kind: input, shape index: {}]   ;;  %s3767_s8 = inlined_call_operand.hbm [shape: bf16[32,64], index: 8, kind: input, shape index: {}]   ;;  %s3768_s9 = inlined_call_operand.hbm [shape: f32[1,64], index: 9, kind: input, shape index: {}]   ;;  %s3769_s10 = inlined_call_operand.hbm [shape: bf16[64,32], index: 10, kind: input, shape index: {}]   ;;  %s3770_s11 = inlined_call_operand.hbm [shape: f32[1,32], index: 11, kind: input, shape index: {}]   ;;  %s3771_s12 = inlined_call_operand.hbm [shape: f32[1,32], index: 12, kind: input, shape index: {}]   ;;  %s3772_s13 = inlined_call_operand.hbm [shape: f32[1,32], index: 13, kind: input, shape index: {}]   ;;  %s3773_s14 = inlined_call_operand.hbm [shape: f32[2,8,32], index: 14, kind: output, shape index: {0}]   ;;  %s3774_s15 = inlined_call_operand.hbm [shape: f32[2,8,32], index: 15, kind: output, shape index: {1}]  }
   0x1   :  { %3792 = sst [smem:[#allocation46_spill]] %s3759_s0 }
   0x2   :  { %3793 = sst [smem:[#allocation47_spill]] %s3760_s1 }
   0x3   :  { %3794 = sst [smem:[#allocation48_spill]] %s3761_s2 }
   0x4   :  { %3795 = sst [smem:[#allocation49_spill]] %s3762_s3 }
   0x5   :  { %3796 = sst [smem:[#allocation50_spill]] %s3763_s4 }
   0x6   :  { %3797 = sst [smem:[#allocation51_spill]] %s3764_s5 }
   0x7   :  { %3798 = sst [smem:[#allocation52_spill]] %s3765_s6 }
   0x8   :  { %3799 = sst [smem:[#allocation53_spill]] %s3773_s14 }
   0x9   :  { %3800 = sst [smem:[#allocation54_spill]] %s3774_s15 }
   0xa   :  { %21 = vsyncpa [#allocation5], 0 }
   0xb   :  { %23 = vsyncpa [#allocation5 + $0x1], 0 }
   0xc   :  { %24 = vsyncpa [#allocation8], 0 }
   0xd   :  { %26 = vsyncpa [#allocation8 + $0x1], 0 }
   0xe   :  { %27 = vsyncpa [#allocation11], 0 }
   0xf   :  { %28 = vsyncpa [#allocation14], 0 }
  0x10   :  { %29 = vsyncpa [#allocation17], 0 }
  0x11   :  { %30 = vsyncpa [#allocation20], 0 }
  0x12   :  { %31 = vsyncpa [#allocation23], 0 }
  0x13   :  { %32 = vsyncpa [#allocation26], 0 }
  0x14   :  { %33 = vsyncpa [#allocation6], 0 }
  0x15   :  { %35 = vsyncpa [#allocation6 + $0x1], 0 }
  0x16   :  { %36 = vsyncpa [#allocation29], 0 }
  0x17   :  { %38 = vsyncpa [#allocation29 + $0x1], 0  ;;  %s3080_s18 = smov 0   ;;  %s3082_s19 = smov 0  }
  0x18   :  { %s3084_s20 = smov 0   ;;  %s3086_s21 = smov 0  }
  0x19   :  { %s3088_s22 = smov 0   ;;  %s3090_s23 = smov 0  }
  0x1a LB: > { %3801 = sst [smem:[#allocation41_spill]] %s2948_s18  ;;  %s3111_s24 = sadd.s32 4294967295, %s2968_s23   ;;  %s2968_s23 = sphi %s3090_s23, %s44_s23   ;;  %s2964_s22 = sphi %s3088_s22, %s3861_s22   ;;  %s2960_s21 = sphi %s3086_s21, %s3860_s21   ;;  %s2956_s20 = sphi %s3084_s20, %s3859_s20   ;;  %s2952_s19 = sphi %s3082_s19, %s3858_s19   ;;  %s2948_s18 = sphi %s3080_s18, %s3857_s18  }
  0x1b   : > { %3802 = sst [smem:[#allocation42_spill]] %s2952_s19  ;;  %p1971_p0 = scmp.ge.s32.totalorder %s2968_s23, 1 }
  0x1c   : > { %3803 = sst [smem:[#allocation43_spill]] %s2960_s21  ;;  %p3785_p1 = scmp.eq.s32.totalorder %s3111_s24, 0 }
  0x1d   : > { %3804 = sst [smem:[#allocation44_spill]] %s3111_s24  ;;  %p423_p2 = scmp.lt.s32.totalorder %s2968_s23, 3 }
  0x1e   : > { %s2970_s26 = smov [#allocation9]   ;;  %s2971_s29 = smov [#allocation10]  }
  0x1f   : > { %p3116_p3 = pnand %p1971_p0, %p423_p2  ;;  %s435_s27 = sshll.u32 %s2970_s26, 4  ;;  %s3120_s27 = int_to_ptr.vmem [resolvable:$true] %s435_s27 }
  0x20   : > { %s448_s30 = sshll.u32 %s2971_s29, 4  ;;  %s2972_s16 = smov [#allocation13]   ;;  %s3131_s30 = int_to_ptr.vmem [resolvable:$true] %s448_s30 }
  0x21   : > { %s3805_s25 = scalar_select %p3116_p3, 1, 0 }
  0x22   : > { %p2235_p4 = pneg %p3116_p3  ;;  %s3133_s17 = sshll.u32 %s2972_s16, 4  ;;  %s476_s17 = int_to_ptr.vmem [resolvable:$true] %s3133_s17 }
  0x23   : > { %3806 = sst [smem:[#allocation45_spill]] %s3805_s25  ;;  %s3808_s2 = sld [smem:[#allocation48_spill]] }
  0x24   : > { %p3127_p6 = pnand %p2235_p4, %p3785_p1 }
  0x26   : > { %p3143_p8 = pneg %p3127_p6 }
  0x29   : > { %s2426_s15 = scalar_lea.hbm %s3808_s2, 256 }
  0x2a   : > { %p2427_p7 = scmp.ne.s32.totalorder %s3808_s2, %s2426_s15  ;;  %p2433_p11 = scmp.lt.u32.totalorder %s2426_s15, %s3808_s2 }
  0x2c   : > { %p2429_p9 = pnand %p3143_p8, %p2427_p7 }
  0x2e   : > { %p2430_p10 = pneg %p2429_p9 }
  0x30   : > { %p2435_p12 = pnand %p2433_p11, %p2430_p10 }
  0x32   : > { %2438 = shalt.err (!%p2435_p12)
}
  0x33   : > { %s2439_s14 = scalar_lea.vmem %s3120_s27, 256  ;;  %p2447_p4 = scmp.lt.s32.totalorder %s3120_s27, %s3120_s27 }
  0x34   : > { %p2440_p13 = scmp.ne.s32.totalorder %s3120_s27, %s2439_s14  ;;  %p2448_p5 = scmp.lt.s32.totalorder %s2439_s14, %s2439_s14 }
  0x36   : > { %p2442_p0 = pnand %p2440_p13, %p3143_p8  ;;  %p2449_p7 = por %p2448_p5, %p2447_p4 }
  0x38   : > { %p2443_p2 = pneg %p2442_p0 }
  0x3a   : > { %p2450_p9 = pnand %p2449_p7, %p2443_p2 }
  0x3c   : > { %2453 = shalt.err (!%p2450_p9)
}
  0x3d   : > { %s3787_s21 = smov 64   ;;  %s2974_s15 = smov 4  }
  0x3e   : > { %2238 = dma.hbm_to_vmem [thread:$0]  (!%p3127_p6), %s3808_s2, 256, %s3120_s27, [#allocation8], %s3787_s21, %s3787_s21, %s2974_s15  }
  0x3f   : > { %s3810_s3 = sld [smem:[#allocation49_spill]] }
  0x45   : > { %s2454_s14 = scalar_lea.hbm %s3810_s3, 256 }
  0x46   : > { %p2455_p5 = scmp.ne.s32.totalorder %s3810_s3, %s2454_s14  ;;  %p2461_p12 = scmp.lt.u32.totalorder %s2454_s14, %s3810_s3 }
  0x48   : > { %p2457_p10 = pnand %p2455_p5, %p3143_p8 }
  0x4a   : > { %p2458_p11 = pneg %p2457_p10 }
  0x4c   : > { %p2463_p13 = pnand %p2461_p12, %p2458_p11 }
  0x4e   : > { %2466 = shalt.err (!%p2463_p13)
}
  0x4f   : > { %s2467_s27 = scalar_lea.vmem %s3131_s30, 256  ;;  %p2475_p7 = scmp.lt.s32.totalorder %s3131_s30, %s3131_s30 }
  0x50   : > { %p2468_p0 = scmp.ne.s32.totalorder %s3131_s30, %s2467_s27  ;;  %p2476_p9 = scmp.lt.s32.totalorder %s2467_s27, %s2467_s27 }
  0x52   : > { %p2470_p2 = pnand %p2468_p0, %p3143_p8  ;;  %p2477_p5 = por %p2476_p9, %p2475_p7 }
  0x54   : > { %p2471_p4 = pneg %p2470_p2 }
  0x56   : > { %p2478_p10 = pnand %p2477_p5, %p2471_p4 }
  0x58   : > { %2481 = shalt.err (!%p2478_p10)
}
  0x59   : > { %2241 = dma.hbm_to_vmem [thread:$0]  (!%p3127_p6), %s3810_s3, 256, %s3131_s30, [#allocation11], %s3787_s21, %s3787_s21, %s2974_s15  }
  0x5a   : > { %s3811_s5 = sld [smem:[#allocation51_spill]] }
  0x60   : > { %s2482_s25 = scalar_lea.hbm %s3811_s5, 16 }
  0x61   : > { %p2483_p11 = scmp.ne.s32.totalorder %s3811_s5, %s2482_s25  ;;  %p2489_p0 = scmp.lt.u32.totalorder %s2482_s25, %s3811_s5 }
  0x63   : > { %p2485_p12 = pnand %p2483_p11, %p3143_p8 }
  0x65   : > { %p2486_p13 = pneg %p2485_p12 }
  0x67   : > { %p2491_p2 = pnand %p2489_p0, %p2486_p13 }
  0x69   : > { %2494 = shalt.err (!%p2491_p2)
}
  0x6a   : > { %s2495_s27 = scalar_lea.vmem %s476_s17, 16  ;;  %s2502_s30 = scalar_lea.vmem %s476_s17, 32 }
  0x6b   : > { %p2496_p4 = scmp.ne.s32.totalorder %s476_s17, %s2495_s27  ;;  %p2503_p5 = scmp.lt.s32.totalorder %s476_s17, %s476_s17 }
  0x6c   : > { %p2504_p10 = scmp.lt.s32.totalorder %s2502_s30, %s2495_s27 }
  0x6d   : > { %p2498_p7 = pnand %p2496_p4, %p3143_p8 }
  0x6e   : > { %p2505_p1 = por %p2504_p10, %p2503_p5 }
  0x6f   : > { %p2499_p9 = pneg %p2498_p7 }
  0x71   : > { %p2506_p3 = pnand %p2505_p1, %p2499_p9 }
  0x73   : > { %2509 = shalt.err (!%p2506_p3)
}
  0x74   : > { %2247 = dma.hbm_to_vmem [thread:$0]  (!%p3127_p6), %s3811_s5, 16, %s476_s17, [#allocation14]  }
  0x75   : > { %s2975_s19 = smov [#allocation16]   ;;  %s2976_s25 = smov [#allocation19]  }
  0x76   : > { %s497_s24 = sshll.u32 %s2975_s19, 4  ;;  %s521_s26 = sshll.u32 %s2976_s25, 4  ;;  %s498_s24 = int_to_ptr.vmem [resolvable:$true] %s497_s24  ;;  %s522_s26 = int_to_ptr.vmem [resolvable:$true] %s521_s26 }
  0x77   : > { %s2510_s14 = scalar_lea.hbm %s3766_s7, 16 }
  0x78   : > { %p2511_p1 = scmp.ne.s32.totalorder %s3766_s7, %s2510_s14  ;;  %p2517_p12 = scmp.lt.u32.totalorder %s2510_s14, %s3766_s7 }
  0x7a   : > { %p2513_p3 = pnand %p2511_p1, %p3143_p8 }
  0x7c   : > { %p2514_p11 = pneg %p2513_p3 }
  0x7e   : > { %p2519_p13 = pnand %p2517_p12, %p2514_p11 }
  0x80   : > { %2522 = shalt.err (!%p2519_p13)
}
  0x81   : > { %s2523_s17 = scalar_lea.vmem %s498_s24, 16  ;;  %s2530_s18 = scalar_lea.vmem %s498_s24, 32 }
  0x82   : > { %p2524_p0 = scmp.ne.s32.totalorder %s498_s24, %s2523_s17  ;;  %p2531_p7 = scmp.lt.s32.totalorder %s498_s24, %s498_s24 }
  0x83   : > { %p2532_p9 = scmp.lt.s32.totalorder %s2530_s18, %s2523_s17 }
  0x84   : > { %p2526_p2 = pnand %p2524_p0, %p3143_p8 }
  0x85   : > { %p2533_p5 = por %p2532_p9, %p2531_p7 }
  0x86   : > { %p2527_p4 = pneg %p2526_p2 }
  0x88   : > { %p2534_p10 = pnand %p2533_p5, %p2527_p4 }
  0x8a   : > { %2537 = shalt.err (!%p2534_p10)
}
  0x8b   : > { %2253 = dma.hbm_to_vmem [thread:$0]  (!%p3127_p6), %s3766_s7, 16, %s498_s24, [#allocation17]  }
  0x8c   : > { %s2538_s16 = scalar_lea.hbm %s3768_s9, 16 }
  0x8d   : > { %p2539_p1 = scmp.ne.s32.totalorder %s3768_s9, %s2538_s16  ;;  %p2545_p12 = scmp.lt.u32.totalorder %s2538_s16, %s3768_s9 }
  0x8f   : > { %p2541_p3 = pnand %p2539_p1, %p3143_p8 }
  0x91   : > { %p2542_p11 = pneg %p2541_p3 }
  0x93   : > { %p2547_p13 = pnand %p2545_p12, %p2542_p11 }
  0x95   : > { %2550 = shalt.err (!%p2547_p13)
}
  0x96   : > { %s2551_s17 = scalar_lea.vmem %s522_s26, 16  ;;  %s2558_s24 = scalar_lea.vmem %s522_s26, 32 }
  0x97   : > { %p2552_p0 = scmp.ne.s32.totalorder %s522_s26, %s2551_s17  ;;  %p2559_p7 = scmp.lt.s32.totalorder %s522_s26, %s522_s26 }
  0x98   : > { %p2560_p9 = scmp.lt.s32.totalorder %s2558_s24, %s2551_s17 }
  0x99   : > { %p2554_p2 = pnand %p2552_p0, %p3143_p8 }
  0x9a   : > { %p2561_p5 = por %p2560_p9, %p2559_p7 }
  0x9b   : > { %p2555_p4 = pneg %p2554_p2 }
  0x9d   : > { %p2562_p10 = pnand %p2561_p5, %p2555_p4 }
  0x9f   : > { %2565 = shalt.err (!%p2562_p10)
}
  0xa0   : > { %2259 = dma.hbm_to_vmem [thread:$0]  (!%p3127_p6), %s3768_s9, 16, %s522_s26, [#allocation20]  }
  0xa1   : > { %s2977_s25 = smov [#allocation22]   ;;  %s2978_s29 = smov [#allocation12]  }
  0xa2   : > { %s545_s21 = sshll.u32 %s2977_s25, 4  ;;  %s461_s16 = sshll.u32 %s2978_s29, 4  ;;  %s546_s21 = int_to_ptr.vmem [resolvable:$true] %s545_s21  ;;  %s462_s16 = int_to_ptr.vmem [resolvable:$true] %s461_s16 }
  0xa3   : > { %s2566_s30 = scalar_lea.hbm %s3770_s11, 16 }
  0xa4   : > { %p2567_p1 = scmp.ne.s32.totalorder %s3770_s11, %s2566_s30  ;;  %p2573_p12 = scmp.lt.u32.totalorder %s2566_s30, %s3770_s11 }
  0xa6   : > { %p2569_p3 = pnand %p2567_p1, %p3143_p8 }
  0xa8   : > { %p2570_p11 = pneg %p2569_p3 }
  0xaa   : > { %p2575_p13 = pnand %p2573_p12, %p2570_p11 }
  0xac   : > { %2578 = shalt.err (!%p2575_p13)
}
  0xad   : > { %s2579_s26 = scalar_lea.vmem %s546_s21, 16  ;;  %s2586_s19 = scalar_lea.vmem %s546_s21, 32 }
  0xae   : > { %p2580_p0 = scmp.ne.s32.totalorder %s546_s21, %s2579_s26  ;;  %p2587_p7 = scmp.lt.s32.totalorder %s546_s21, %s546_s21 }
  0xaf   : > { %p2588_p9 = scmp.lt.s32.totalorder %s2586_s19, %s2579_s26 }
  0xb0   : > { %p2582_p2 = pnand %p2580_p0, %p3143_p8 }
  0xb1   : > { %p2589_p5 = por %p2588_p9, %p2587_p7 }
  0xb2   : > { %p2583_p4 = pneg %p2582_p2 }
  0xb4   : > { %p2590_p10 = pnand %p2589_p5, %p2583_p4 }
  0xb6   : > { %2593 = shalt.err (!%p2590_p10)
}
  0xb7   : > { %2265 = dma.hbm_to_vmem [thread:$0]  (!%p3127_p6), %s3770_s11, 16, %s546_s21, [#allocation23]  }
  0xb8   : > { %s3812_s4 = sld [smem:[#allocation50_spill]] }
  0xbe   : > { %s2594_s30 = scalar_lea.hbm %s3812_s4, 256 }
  0xbf   : > { %p2595_p1 = scmp.ne.s32.totalorder %s3812_s4, %s2594_s30  ;;  %p2601_p12 = scmp.lt.u32.totalorder %s2594_s30, %s3812_s4 }
  0xc1   : > { %p2597_p3 = pnand %p2595_p1, %p3143_p8 }
  0xc3   : > { %p2598_p11 = pneg %p2597_p3 }
  0xc5   : > { %p2603_p13 = pnand %p2601_p12, %p2598_p11 }
  0xc7   : > { %2606 = shalt.err (!%p2603_p13)
}
  0xc8   : > { %s2607_s26 = scalar_lea.vmem %s462_s16, 256  ;;  %p2615_p7 = scmp.lt.s32.totalorder %s462_s16, %s462_s16 }
  0xc9   : > { %p2608_p0 = scmp.ne.s32.totalorder %s462_s16, %s2607_s26  ;;  %p2616_p9 = scmp.lt.s32.totalorder %s2607_s26, %s2607_s26 }
  0xcb   : > { %p2610_p2 = pnand %p2608_p0, %p3143_p8  ;;  %p2617_p5 = por %p2616_p9, %p2615_p7 }
  0xcd   : > { %p2611_p4 = pneg %p2610_p2 }
  0xcf   : > { %p2618_p10 = pnand %p2617_p5, %p2611_p4 }
  0xd1   : > { %2621 = shalt.err (!%p2618_p10)
}
  0xd2   : > { %s3813_s21 = smov 64   ;;  %s2979_s29 = smov [#allocation15]  }
  0xd3   : > { %2244 = dma.hbm_to_vmem [thread:$0]  (!%p3127_p6), %s3812_s4, 256, %s462_s16, [#allocation11], %s3813_s21, %s3813_s21, %s2974_s15  }
  0xd4   : > { %s486_s14 = sshll.u32 %s2979_s29, 4  ;;  %s2980_s27 = smov [#allocation18]   ;;  %s487_s14 = int_to_ptr.vmem [resolvable:$true] %s486_s14 }
  0xd5   : > { %s507_s30 = sshll.u32 %s2980_s27, 4  ;;  %s3814_s6 = sld [smem:[#allocation52_spill]]  ;;  %s508_s30 = int_to_ptr.vmem [resolvable:$true] %s507_s30 }
  0xdb   : > { %s2622_s24 = scalar_lea.hbm %s3814_s6, 16 }
  0xdc   : > { %p2623_p1 = scmp.ne.s32.totalorder %s3814_s6, %s2622_s24  ;;  %p2629_p12 = scmp.lt.u32.totalorder %s2622_s24, %s3814_s6 }
  0xde   : > { %p2625_p3 = pnand %p2623_p1, %p3143_p8 }
  0xe0   : > { %p2626_p11 = pneg %p2625_p3 }
  0xe2   : > { %p2631_p13 = pnand %p2629_p12, %p2626_p11 }
  0xe4   : > { %2634 = shalt.err (!%p2631_p13)
}
  0xe5   : > { %s2635_s16 = scalar_lea.vmem %s487_s14, 16  ;;  %s2642_s25 = scalar_lea.vmem %s487_s14, 32 }
  0xe6   : > { %p2636_p0 = scmp.ne.s32.totalorder %s487_s14, %s2635_s16  ;;  %p2643_p7 = scmp.lt.s32.totalorder %s487_s14, %s487_s14 }
  0xe7   : > { %p2644_p9 = scmp.lt.s32.totalorder %s2642_s25, %s2635_s16 }
  0xe8   : > { %p2638_p2 = pnand %p2636_p0, %p3143_p8 }
  0xe9   : > { %p2645_p5 = por %p2644_p9, %p2643_p7 }
  0xea   : > { %p2639_p4 = pneg %p2638_p2 }
  0xec   : > { %p2646_p10 = pnand %p2645_p5, %p2639_p4 }
  0xee   : > { %2649 = shalt.err (!%p2646_p10)
}
  0xef   : > { %2250 = dma.hbm_to_vmem [thread:$0]  (!%p3127_p6), %s3814_s6, 16, %s487_s14, [#allocation14]  }
  0xf0   : > { %s2650_s17 = scalar_lea.hbm %s3767_s8, 256 }
  0xf1   : > { %p2651_p1 = scmp.ne.s32.totalorder %s3767_s8, %s2650_s17  ;;  %p2657_p12 = scmp.lt.u32.totalorder %s2650_s17, %s3767_s8 }
  0xf3   : > { %p2653_p3 = pnand %p2651_p1, %p3143_p8 }
  0xf5   : > { %p2654_p11 = pneg %p2653_p3 }
  0xf7   : > { %p2659_p13 = pnand %p2657_p12, %p2654_p11 }
  0xf9   : > { %2662 = shalt.err (!%p2659_p13)
}
  0xfa   : > { %s2663_s16 = scalar_lea.vmem %s508_s30, 256  ;;  %p2671_p7 = scmp.lt.s32.totalorder %s508_s30, %s508_s30 }
  0xfb   : > { %p2664_p0 = scmp.ne.s32.totalorder %s508_s30, %s2663_s16  ;;  %p2672_p9 = scmp.lt.s32.totalorder %s2663_s16, %s2663_s16 }
  0xfd   : > { %p2666_p2 = pnand %p2664_p0, %p3143_p8  ;;  %p2673_p5 = por %p2672_p9, %p2671_p7 }
  0xff   : > { %p2667_p4 = pneg %p2666_p2 }
 0x101   : > { %p2674_p10 = pnand %p2673_p5, %p2667_p4 }
 0x103   : > { %2677 = shalt.err (!%p2674_p10)
}
 0x104   : > { %2256 = dma.hbm_to_vmem [thread:$0]  (!%p3127_p6), %s3767_s8, 256, %s508_s30, [#allocation17], %s3813_s21, %s3813_s21, %s2974_s15  }
 0x105   : > { %s2981_s29 = smov [#allocation21]   ;;  %s2982_s2 = smov [#allocation24]  }
 0x106   : > { %s531_s27 = sshll.u32 %s2981_s29, 4  ;;  %s556_s0 = sshll.u32 %s2982_s2, 4  ;;  %s532_s27 = int_to_ptr.vmem [resolvable:$true] %s531_s27  ;;  %s557_s0 = int_to_ptr.vmem [resolvable:$true] %s556_s0 }
 0x107   : > { %s2678_s18 = scalar_lea.hbm %s3769_s10, 512 }
 0x108   : > { %p2679_p1 = scmp.ne.s32.totalorder %s3769_s10, %s2678_s18  ;;  %p2685_p12 = scmp.lt.u32.totalorder %s2678_s18, %s3769_s10 }
 0x10a   : > { %p2681_p3 = pnand %p2679_p1, %p3143_p8 }
 0x10c   : > { %p2682_p11 = pneg %p2681_p3 }
 0x10e   : > { %p2687_p13 = pnand %p2685_p12, %p2682_p11 }
 0x110   : > { %2690 = shalt.err (!%p2687_p13)
}
 0x111   : > { %s2691_s30 = scalar_lea.vmem %s532_s27, 512  ;;  %p2699_p7 = scmp.lt.s32.totalorder %s532_s27, %s532_s27 }
 0x112   : > { %p2692_p0 = scmp.ne.s32.totalorder %s532_s27, %s2691_s30  ;;  %p2700_p9 = scmp.lt.s32.totalorder %s2691_s30, %s2691_s30 }
 0x114   : > { %p2694_p2 = pnand %p2692_p0, %p3143_p8  ;;  %p2701_p5 = por %p2700_p9, %p2699_p7 }
 0x116   : > { %p2695_p4 = pneg %p2694_p2 }
 0x118   : > { %p2702_p10 = pnand %p2701_p5, %p2695_p4 }
 0x11a   : > { %2705 = shalt.err (!%p2702_p10)
}
 0x11b   : > { %2262 = dma.hbm_to_vmem [thread:$0]  (!%p3127_p6), %s3769_s10, 512, %s532_s27, [#allocation20], %s3813_s21, %s3813_s21, %s2974_s15  }
 0x11c   : > { %s2706_s24 = scalar_lea.hbm %s3771_s12, 16 }
 0x11d   : > { %p2707_p1 = scmp.ne.s32.totalorder %s3771_s12, %s2706_s24  ;;  %p2713_p12 = scmp.lt.u32.totalorder %s2706_s24, %s3771_s12 }
 0x11f   : > { %p2709_p3 = pnand %p2707_p1, %p3143_p8 }
 0x121   : > { %p2710_p11 = pneg %p2709_p3 }
 0x123   : > { %p2715_p13 = pnand %p2713_p12, %p2710_p11 }
 0x125   : > { %2718 = shalt.err (!%p2715_p13)
}
 0x126   : > { %s2719_s14 = scalar_lea.vmem %s557_s0, 16  ;;  %s2726_s15 = scalar_lea.vmem %s557_s0, 32 }
 0x127   : > { %p2720_p0 = scmp.ne.s32.totalorder %s557_s0, %s2719_s14  ;;  %p2727_p7 = scmp.lt.s32.totalorder %s557_s0, %s557_s0 }
 0x128   : > { %p2728_p9 = scmp.lt.s32.totalorder %s2726_s15, %s2719_s14 }
 0x129   : > { %p2722_p2 = pnand %p2720_p0, %p3143_p8 }
 0x12a   : > { %p2729_p5 = por %p2728_p9, %p2727_p7 }
 0x12b   : > { %p2723_p4 = pneg %p2722_p2 }
 0x12d   : > { %p2730_p10 = pnand %p2729_p5, %p2723_p4 }
 0x12f   : > { %2733 = shalt.err (!%p2730_p10)
}
 0x130   : > { %2268 = dma.hbm_to_vmem [thread:$0]  (!%p3127_p6), %s3771_s12, 16, %s557_s0, [#allocation23]  }
 0x131   : > { %s2983_s30 = smov [#allocation25]   ;;  %s2734_s17 = scalar_lea.hbm %s3772_s13, 16 }
 0x132   : > { %s567_s25 = sshll.u32 %s2983_s30, 4  ;;  %p2735_p1 = scmp.ne.s32.totalorder %s3772_s13, %s2734_s17  ;;  %s568_s25 = int_to_ptr.vmem [resolvable:$true] %s567_s25 }
 0x133   : > { %p2741_p12 = scmp.lt.u32.totalorder %s2734_s17, %s3772_s13 }
 0x134   : > { %p2737_p3 = pnand %p2735_p1, %p3143_p8 }
 0x136   : > { %p2738_p11 = pneg %p2737_p3 }
 0x138   : > { %p2743_p13 = pnand %p2741_p12, %p2738_p11 }
 0x13a   : > { %2746 = shalt.err (!%p2743_p13)
}
 0x13b   : > { %s2747_s0 = scalar_lea.vmem %s568_s25, 16  ;;  %s2754_s16 = scalar_lea.vmem %s568_s25, 32 }
 0x13c   : > { %p2748_p0 = scmp.ne.s32.totalorder %s568_s25, %s2747_s0  ;;  %p2755_p7 = scmp.lt.s32.totalorder %s568_s25, %s568_s25 }
 0x13d   : > { %p2756_p9 = scmp.lt.s32.totalorder %s2754_s16, %s2747_s0 }
 0x13e   : > { %p2750_p2 = pnand %p2748_p0, %p3143_p8 }
 0x13f   : > { %p2757_p5 = por %p2756_p9, %p2755_p7 }
 0x140   : > { %p2751_p4 = pneg %p2750_p2 }
 0x142   : > { %p2758_p10 = pnand %p2757_p5, %p2751_p4 }
 0x144   : > { %2761 = shalt.err (!%p2758_p10)
}
 0x145   : > { %s3815_s21 = sld [smem:[#allocation42_spill]]  ;;  %s3816_s1 = sld [smem:[#allocation41_spill]] }
 0x146   : > { %s3817_s27 = sld [smem:[#allocation44_spill]]  ;;  %s1970_s30 = sadd.s32 4294967294, %s2968_s23  }
 0x147   : > { %2271 = dma.hbm_to_vmem [thread:$0]  (!%p3127_p6), %s3772_s13, 16, %s568_s25, [#allocation26]  }
 0x148   : > { %s56_s29 = sadd.s32 1, %s2964_s22  ;;  %s65_s28 = sadd.s32 1, %s2956_s20 }
 0x149   : > { %p58_p8 = scmp.ge.s32.totalorder %s56_s29, 2  ;;  %p73_p3 = scmp.eq.s32.totalorder %s2968_s23, 0 }
 0x14a   : > { %p388_p7 = scmp.eq.s32.totalorder %s1970_s30, 1  ;;  %p2298_p5 = scmp.lt.s32.totalorder %s2968_s23, 2 }
 0x14b   : > { %p72_p1 = scmp.ne.s32.totalorder %s2956_s20, %s3815_s21  ;;  %s3863_s29 = smov (%p58_p8, %s56_s29), 0 }
 0x14c   : > { %p78_p12 = scmp.ne.s32.totalorder %s3815_s21, %s3816_s1  ;;  %s60_s25 = ssub.s32 %s2964_s22, %s3863_s29 }
 0x14d   : > { %p3391_p11 = por %p73_p3, %p72_p1  ;;  %p382_p6 = scmp.eq.s32.totalorder %s3817_s27, 1 }
 0x14e   : > { %p63_p13 = scmp.eq.s32.totalorder %s60_s25, 0  ;;  %p3819_p0 = scmp.eq.s32.totalorder %s3817_s27, 0 }
 0x14f   : > { %p3406_p4 = por %p382_p6, %p72_p1  ;;  %p3413_p9 = por %p388_p7, %p78_p12 }
 0x150   : > { %p3402_p2 = por %p3819_p0, %p78_p12  ;;  %s3419_s19 = sand.u32 1, %s2956_s20  }
 0x151   : > { %s3821_s24 = scalar_select %p3406_p4, 1, 0 }
 0x152   : > { %s3820_s17 = scalar_select %p3402_p2, 1, 0 }
 0x153   : > { %s3411_s18 = scalar_select %p63_p13, %s2956_s20, %s65_s28  }
 0x154   : > { %s3822_s26 = scalar_select %p3413_p9, 1, 0 }
 0x155   : > { %s1986_s0 = sshll.u32 %s2964_s22, 7  ;;  %s1985_s16 = sshll.u32 %s3419_s19, 3 }
 0x156   : > { %s3823_s21 = sld [smem:[#allocation46_spill]]  ;;  %s582_s30 = scalar_lea.vmem [#allocation4], %s1985_s16 }
 0x157   : > { %s590_s28 = sshll.u32 %s582_s30, 4  ;;  %p3430_p10 = pnand %p2298_p5, %p3391_p11  ;;  %s3434_s28 = int_to_ptr.vmem [resolvable:$true] %s590_s28 }
 0x158   : > { %s579_s4 = scalar_lea.sflag [#allocation5], %s3419_s19 }
 0x159   : > { %p2764_p1 = pneg %p3430_p10 }
 0x15c   : > { %s3824_s1 = smov %s3823_s21  ;;  %s3426_s27 = scalar_lea.hbm %s3823_s21, %s1986_s0 }
 0x15d   : > { %s2762_s14 = scalar_lea.hbm %s3426_s27, 128  ;;  %s2767_s16 = scalar_lea.hbm %s3824_s1, 256 }
 0x15e   : > { %p2763_p8 = scmp.ne.s32.totalorder %s3426_s27, %s2762_s14  ;;  %p2768_p11 = scmp.lt.u32.totalorder %s3426_s27, %s3824_s1 }
 0x15f   : > { %p2769_p6 = scmp.lt.u32.totalorder %s2767_s16, %s2762_s14  ;;  %p2771_p0 = scmp.lt.u32.totalorder %s2762_s14, %s3426_s27 }
 0x160   : > { %p2765_p3 = pnand %p2764_p1, %p2763_p8 }
 0x161   : > { %p2770_p13 = por %p2769_p6, %p2768_p11 }
 0x162   : > { %p2766_p12 = pneg %p2765_p3 }
 0x163   : > { %p2772_p7 = por %p2771_p0, %p2770_p13 }
 0x165   : > { %p2773_p5 = pnand %p2772_p7, %p2766_p12 }
 0x167   : > { %2776 = shalt.err (!%p2773_p5)
}
 0x168   : > { %s2777_s30 = scalar_lea.vmem %s3434_s28, 128  ;;  %s2984_s0 = smov [#allocation4]  }
 0x169   : > { %p2778_p8 = scmp.ne.s32.totalorder %s3434_s28, %s2777_s30  ;;  %s2782_s2 = sshll.u32 %s2984_s0, 4  ;;  %s2783_s2 = int_to_ptr.vmem [resolvable:$false] %s2782_s2 }
 0x16a   : > { %s2784_s15 = scalar_lea.vmem %s2783_s2, 256  ;;  %p2785_p4 = scmp.lt.s32.totalorder %s3434_s28, %s2783_s2 }
 0x16b   : > { %p2780_p3 = pnand %p2778_p8, %p2764_p1  ;;  %p2786_p11 = scmp.lt.s32.totalorder %s2784_s15, %s2777_s30 }
 0x16d   : > { %p2781_p9 = pneg %p2780_p3  ;;  %p2787_p6 = por %p2786_p11, %p2785_p4 }
 0x16f   : > { %p2788_p13 = pnand %p2787_p6, %p2781_p9 }
 0x171   : > { %2791 = shalt.err (!%p2788_p13)
}
 0x172   : > { %2275 = dma.hbm_to_vmem [thread:$0]  (!%p3430_p10), %s3426_s27, 128, %s3434_s28, %s579_s4  }
 0x173   : > { %s1987_s14 = sshll.u32 %s3419_s19, 2  ;;  %s1988_s16 = sshll.u32 %s2964_s22, 6 }
 0x174   : > { %s3826_s3 = sld [smem:[#allocation47_spill]]  ;;  %s601_s30 = scalar_lea.vmem [#allocation7], %s1987_s14 }
 0x175   : > { %s608_s2 = sshll.u32 %s601_s30, 4  ;;  %s3827_s15 = sand.u32 1, %s2968_s23   ;;  %s609_s2 = int_to_ptr.vmem [resolvable:$true] %s608_s2 }
 0x176   : > { %s598_s5 = scalar_lea.sflag [#allocation8], %s3827_s15 }
 0x17a   : > { %s3468_s1 = scalar_lea.hbm %s3826_s3, %s1988_s16  ;;  %s2797_s27 = scalar_lea.hbm %s3826_s3, 128 }
 0x17b   : > { %s2792_s6 = scalar_lea.hbm %s3468_s1, 64  ;;  %p2798_p0 = scmp.lt.u32.totalorder %s3468_s1, %s3826_s3 }
 0x17c   : > { %p2793_p4 = scmp.ne.s32.totalorder %s3468_s1, %s2792_s6  ;;  %p2799_p7 = scmp.lt.u32.totalorder %s2797_s27, %s2792_s6 }
 0x17d   : > { %p2801_p8 = scmp.lt.u32.totalorder %s2792_s6, %s3468_s1 }
 0x17e   : > { %p2795_p9 = pnand %p2793_p4, %p2764_p1  ;;  %p2800_p5 = por %p2799_p7, %p2798_p0 }
 0x180   : > { %p2796_p12 = pneg %p2795_p9  ;;  %p2802_p3 = por %p2801_p8, %p2800_p5 }
 0x182   : > { %p2803_p11 = pnand %p2802_p3, %p2796_p12 }
 0x184   : > { %2806 = shalt.err (!%p2803_p11)
}
 0x185   : > { %s2807_s14 = scalar_lea.vmem %s609_s2, 64  ;;  %s2985_s21 = smov [#allocation7]  }
 0x186   : > { %p2808_p6 = scmp.ne.s32.totalorder %s609_s2, %s2807_s14  ;;  %s2812_s0 = sshll.u32 %s2985_s21, 4  ;;  %s2813_s0 = int_to_ptr.vmem [resolvable:$false] %s2812_s0 }
 0x187   : > { %s2814_s30 = scalar_lea.vmem %s2813_s0, 128  ;;  %p2815_p9 = scmp.lt.s32.totalorder %s609_s2, %s2813_s0 }
 0x188   : > { %p2810_p13 = pnand %p2808_p6, %p2764_p1  ;;  %p2816_p2 = scmp.lt.s32.totalorder %s2814_s30, %s2807_s14 }
 0x18a   : > { %p2811_p4 = pneg %p2810_p13  ;;  %p2817_p0 = por %p2816_p2, %p2815_p9 }
 0x18c   : > { %p2818_p7 = pnand %p2817_p0, %p2811_p4 }
 0x18e   : > { %2821 = shalt.err (!%p2818_p7)
}
 0x18f   : > { %2278 = dma.hbm_to_vmem [thread:$0]  (!%p3430_p10), %s3468_s1, 64, %s609_s2, %s598_s5  }
 0x190   : > { %s3828_s6 = sld [smem:[#allocation45_spill]] }
 0x196   : > { %p3829_p12 = scmp.ne.s32.totalorder %s3828_s6, 0 }
 0x197   : > { %s3830_s15 = sld [smem:[#allocation42_spill]] (!%p3829_p12)  ;;  %p3831_p2 = scmp.ne.s32.totalorder (!%p3829_p12), %s3820_s17, 0 }
 0x198   : > { %617 = sbr.rel (%p3829_p12) target bundleno = 3042 (0xbe2), region = 76 }
 0x19d   : > { %s3494_s4 = sand.u32 (!%p3829_p12), 1, %s3830_s15  }
 0x19e   : > { %s3497_s19 = sshll.u32 (!%p3829_p12), %s3494_s4, 3  ;;  %s620_s27 = scalar_lea.sflag (!%p3829_p12), [#allocation5], %s3494_s4 }
 0x19f   : > { %s623_s28 = scalar_lea.vmem [#allocation4], %s3497_s19 }
 0x1a0   : > { %2903 = dma.done.wait (%p3831_p2), %s620_s27, 128  }
 0x1a1   : > { %2905 = vsyncadd (%p3831_p2), %s620_s27, 4294967168  ;;  %s3832_s5 = sld [smem:[#allocation44_spill]]  ;;  %s1991_s25 = sshll.u32 %s3494_s4, 2 }
 0x1a2   : > { %s632_s16 = scalar_lea.vmem [#allocation7], %s1991_s25 }
 0x1a7   : > { %s628_s1 = sand.u32 1, %s3832_s5  }
 0x1a8   : > { %s629_s2 = scalar_lea.sflag [#allocation8], %s628_s1 }
 0x1a9   : > { %2907 = dma.done.wait (%p3831_p2), %s629_s2, 64  }
 0x1aa   : > { %2909 = vsyncadd (%p3831_p2), %s629_s2, 4294967232  ;;  %p3833_p10 = scmp.eq.s32.totalorder %s3832_s5, 0 }
 0x1ac   : > { %2911 = dma.done.wait (%p3833_p10), [#allocation8], 256   ;;  %p3834_p1 = pmov %p3833_p10 }
 0x1ae   : > { %2913 = vsyncadd (%p3834_p1), [#allocation8], 4294967040  ;;  %p3835_p5 = pmov %p3834_p1 }
 0x1af   : > { %p3836_p8 = pmov %p3834_p1 }
 0x1b0   : > { %2915 = dma.done.wait (%p3835_p5), [#allocation11], 512  }
 0x1b1   : > { %2917 = vsyncadd (%p3836_p8), [#allocation11], 4294966784  ;;  %p3837_p3 = pmov %p3834_p1 }
 0x1b2   : > { %p3838_p11 = pmov %p3834_p1 }
 0x1b3   : > { %2919 = dma.done.wait (%p3837_p3), [#allocation14], 32  }
 0x1b4   : > { %2921 = vsyncadd (%p3838_p11), [#allocation14], 4294967264  ;;  %p3839_p6 = pmov %p3834_p1 }
 0x1b5   : > { %p3840_p13 = pmov %p3834_p1 }
 0x1b6   : > { %2923 = dma.done.wait (%p3839_p6), [#allocation17], 272  }
 0x1b7   : > { %2925 = vsyncadd (%p3840_p13), [#allocation17], 4294967024  ;;  %p3841_p4 = pmov %p3834_p1 }
 0x1b8   : > { %p3842_p9 = pmov %p3834_p1 }
 0x1b9   : > { %2927 = dma.done.wait (%p3841_p4), [#allocation20], 528  }
 0x1ba   : > { %2929 = vsyncadd (%p3842_p9), [#allocation20], 4294966768  ;;  %p3843_p0 = pmov %p3834_p1 }
 0x1bc   : > { %2931 = dma.done.wait (%p3843_p0), [#allocation23], 32   ;;  %p3844_p7 = pmov %p3843_p0 }
 0x1bd   : > { %p3845_p12 = pmov %p3843_p0 }
 0x1be   : > { %2933 = vsyncadd (%p3844_p7), [#allocation23], 4294967264 }
 0x1bf   : > { %2935 = dma.done.wait (%p3845_p12), [#allocation26], 16   ;;  %p3846_p2 = pmov %p3843_p0 }
 0x1c0   : > { %v2986_v0 = vmov 0.0   ;;  %vm2987_vm0 = vmmov 0   ;;  %v2386_v1 = vld [vmem:[#allocation10] sm:$0xff]   ;;  %v2387_v2 = vld [vmem:[#allocation10 + $0x8] sm:$0xff]   ;;  %vm759_vm1 = vcmask 261120   ;;  %v2388_v4 = vld [vmem:[#allocation9] sm:$0xff]  }
 0x1c1   : > { %2937 = vsyncadd (%p3846_p2), [#allocation26], 4294967280  ;;  %2087 = vmatprep.subr.bf16.mxu1 %v2986_v0  ;;  %2091 = vmatprep.mubr.msk.bf16.mxu1 %vm2987_vm0, %v2986_v0  ;;  %v742_v3 = vld [vmem:[%s632_s16] sm:$0xf]  ;;  %v2389_v5 = vld [vmem:[#allocation9 + $0x8] sm:$0xff]   ;;  %vm804_vm2 = vcmask 519168  }
 0x1c2   : > { %2103 = vmatprep.subr.bf16.mxu0 %v2986_v0  ;;  %2105 = vmatprep.mubr.msk.bf16.mxu0 %vm2987_vm0, %v2986_v0  ;;  %v3552_v6 = vld [vmem:[%s623_s28] sm:$0xff]  ;;  %vm870_vm3 = vcmask 64512   ;;  %s2988_s17 = smov 112   ;;  %s2989_s14 = smov 120   ;;  %vm939_vm4 = vcmask 1043456   ;;  %vm984_vm5 = vcmask 60416  }
 0x1c3   : > { %2088 = vmatpush3.bf16.msra.mxu1 %v2386_v1  ;;  %v807_v7 = vpack.c.bf16 %v3552_v6, %v3552_v6  ;;  %s2990_s21 = smov 104   ;;  %s2991_s0 = smov 96   ;;  %vm1115_vm6 = vcmask 126016   ;;  %vm1245_vm7 = vcmask 191616   ;;  %vm1375_vm8 = vcmask 257216  }
 0x1c4   : > { %2089 = vmatprep.subr.bf16.mxu1 %v2986_v0  ;;  %s2992_s30 = smov 80   ;;  %s2993_s6 = smov 72   ;;  %vm1610_vm10 = vcmask 523264   ;;  %vm1057_vm11 = vcmask 130112   ;;  %vm1187_vm12 = vcmask 195712   ;;  %vm1317_vm13 = vcmask 261312  }
 0x1c5   : > { %s2994_s15 = smov 88   ;;  %s3609_s27 = scalar_lea.vmem [#allocation28], %s3497_s19 }
 0x1c6   : > { %s2995_s28 = smov 8   ;;  %s2996_s5 = smov 16  }
 0x1c7   : > { %2090 = vmatpush3.bf16.msra.mxu1 %v2387_v2  ;;  %s2997_s1 = smov 24   ;;  %s3847_s25 = sld [smem:[#allocation43_spill]] }
 0x1c8   : > { %2095 = vmatprep.subr.bf16.mxu1 %v2986_v0  ;;  %s1719_s16 = sshll.u32 %s3609_s27, 4  ;;  %p3850_p1 = scmp.ne.s32.totalorder %s3821_s24, 0  ;;  %s3678_s16 = int_to_ptr.vmem [resolvable:$true] %s1719_s16 }
 0x1ca   : > { %2092 = vmatmul.mubr.msk.bf16.vlgmr.msra.gmra.mrb[0].mxu1 %vm759_vm1, %v742_v3 }
 0x1cb   : > { %2096 = vmatpush3.bf16.msra.mxu1 %v2388_v4  ;;  %2099 = vmatprep.mubr.msk.bf16.mxu1 %vm2987_vm0, %v2986_v0 }
 0x1cc   : > { %2097 = vmatprep.subr.bf16.mxu1 %v2986_v0 }
 0x1cd   : > { %s2047_s2 = sshll.u32 %s3847_s25, 7 }
 0x1cf   : > { %2098 = vmatpush3.bf16.msra.mxu1 %v2389_v5 }
 0x1d0   : > { %2109 = vmatprep.subr.bf16.mxu1 %v2986_v0 }
 0x1d2   : > { %2100 = vmatmul.mubr.msk.bf16.vlgmr.msra.gmra.mrb[4].mxu1 %vm759_vm1, %v807_v7 }
 0x1d3   : > { %2111 = vmatprep.mubr.msk.bf16.mxu1 %vm2987_vm0, %v2986_v0 }
 0x29d   : > { %v797_v8 = vpop.f32.mrb[0].mxu1 }
 0x29e   : > { %v803_v9 = vpack.c.bf16 %v797_v8, %v797_v8  ;;  %v2093_v10 = vpop.f32.mrb[1].mxu1 }
 0x29f   : > { %v800_v11 = vpop.f32.mrb[2].mxu1 }
 0x2a0   : > { %805 = vst.msk [vmem:[#allocation2] sm:$0xf] %vm804_vm2, %v803_v9  ;;  %v2094_v12 = vpop.f32.mrb[3].mxu1 }
 0x2a5   : > { %v862_v13 = vpop.f32.mrb[4].mxu1 }
 0x2a6   : > { %v2101_v14 = vpop.f32.mrb[5].mxu1  ;;  %v868_v20 = vpack.c.bf16 %v862_v13, %v862_v13 }
 0x2a7   : > { %v3561_v15 = vld [vmem:[#allocation2] sm:$0xf]  ;;  %v865_v19 = vpop.f32.mrb[6].mxu1 }
 0x2a8   : > { %v3563_v16 = vld [vmem:[#allocation2] ss:$0 sps:$4 sm:$0xff]   ;;  %v875_v17 = vsel %vm870_vm3, %v3561_v15, 0  ;;  %v2102_v21 = vpop.f32.mrb[7].mxu1  ;;  %v2013_v57 = vcombine.low %v3561_v15, %v3561_v15 }
 0x2a9   : > { %v3567_v18 = vld [vmem:[#allocation2] ss:$0 sps:$4 sm:$0xff]   ;;  %2104 = vmatpush3.bf16.xpose.msra.mxu0 %v875_v17  ;;  %1123 = vrot.lane.b32.xlu1 %v3563_v16, %s2988_s17 }
 0x2aa   : > { %993 = vrot.lane.b32.xlu0 %v3567_v18, %s2989_s14  ;;  %2115 = vmatprep.subr.bf16.mxu0 %v2986_v0  ;;  %v3573_v22 = vld [vmem:[#allocation2] ss:$0 sps:$4 sm:$0xff]  }
 0x2ad   : > { %1118 = vrot.lane.b32.xlu1 %v868_v20, %s2988_s17 }
 0x2ae   : > { %988 = vrot.lane.b32.xlu0 %v868_v20, %s2989_s14 }
 0x2b0   : > { %2106 = vmatmul.mubr.msk.bf16.vlgmr.msra.gmra.mrb[0].mxu0 %vm870_vm3, %v868_v20 }
 0x2b1   : > { %1248 = vrot.lane.b32.xlu1 %v868_v20, %s2990_s21  ;;  %2117 = vmatprep.mubr.msk.bf16.mxu0 %vm2987_vm0, %v2986_v0 }
 0x2b2   : > { %1253 = vrot.lane.b32.xlu0 %v3573_v22, %s2990_s21  ;;  %s3848_s21 = sld [smem:[#allocation54_spill]] }
 0x31b   : > { %v1124_v25 = vpop.permute.xlu1 %1123 }
 0x31c   : > { %v994_v23 = vpop.permute.xlu0 %993  ;;  %v1129_v27 = vsel %vm870_vm3, %v1124_v25, 0 }
 0x31d   : > { %v999_v24 = vsel %vm870_vm3, %v994_v23, 0 }
 0x31e   : > { %2116 = vmatpush3.bf16.xpose.msra.mxu0 %v999_v24 }
 0x31f   : > { %2127 = vmatprep.subr.bf16.mxu0 %v2986_v0  ;;  %v1119_v29 = vpop.permute.xlu1 %1118 }
 0x320   : > { %v989_v26 = vpop.permute.xlu0 %988 }
 0x323   : > { %v1249_v31 = vpop.permute.xlu1 %1248 }
 0x324   : > { %v1254_v28 = vpop.permute.xlu0 %1253 }
 0x325   : > { %2118 = vmatmul.mubr.msk.bf16.vlgmr.msra.gmra.mrb[4].mxu0 %vm870_vm3, %v989_v26  ;;  %v1259_v30 = vsel %vm870_vm3, %v1254_v28, 0 }
 0x326   : > { %2128 = vmatpush3.bf16.xpose.msra.mxu0 %v1129_v27  ;;  %2129 = vmatprep.mubr.msk.bf16.mxu0 %vm2987_vm0, %v2986_v0 }
 0x327   : > { %2139 = vmatprep.subr.bf16.mxu0 %v2986_v0 }
 0x32d   : > { %2130 = vmatmul.mubr.msk.bf16.vlgmr.msra.gmra.mrb[8].mxu0 %vm870_vm3, %v1119_v29 }
 0x32e   : > { %2140 = vmatpush3.bf16.xpose.msra.mxu0 %v1259_v30  ;;  %2141 = vmatprep.mubr.msk.bf16.mxu0 %vm2987_vm0, %v2986_v0 }
 0x32f   : > { %2151 = vmatprep.subr.bf16.mxu0 %v2986_v0 }
 0x335   : > { %2142 = vmatmul.mubr.msk.bf16.vlgmr.msra.gmra.mrb[12].mxu0 %vm870_vm3, %v1249_v31 }
 0x336   : > { %2155 = vmatprep.mubr.msk.bf16.mxu0 %vm2987_vm0, %v2986_v0 }
 0x383   : > { %v911_v32 = vpop.f32.mrb[0].mxu0 }
 0x384   : > { %v2107_v33 = vpop.f32.mrb[1].mxu0  ;;  %v917_v34 = vsel %vm870_vm3, %v911_v32, -inf }
 0x385   : > { %918 = vmax.xlane.f32.xlu0 %v917_v34  ;;  %v914_v35 = vpop.f32.mrb[2].mxu0 }
 0x386   : > { %v2108_v36 = vpop.f32.mrb[3].mxu0 }
 0x3f8   : > { %v1035_v37 = vpop.f32.mrb[4].mxu0 }
 0x3f9   : > { %v2119_v38 = vpop.f32.mrb[5].mxu0  ;;  %v1041_v39 = vsel %vm870_vm3, %v1035_v37, -inf }
 0x3fa   : > { %1042 = vmax.xlane.f32.xlu1 %v1041_v39  ;;  %v1038_v40 = vpop.f32.mrb[6].mxu0 }
 0x3fb   : > { %v2120_v41 = vpop.f32.mrb[7].mxu0 }
 0x400   : > { %v1165_v42 = vpop.f32.mrb[8].mxu0 }
 0x401   : > { %v2131_v43 = vpop.f32.mrb[9].mxu0  ;;  %v1171_v44 = vsel %vm870_vm3, %v1165_v42, -inf }
 0x402   : > { %1172 = vmax.xlane.f32.xlu0 %v1171_v44  ;;  %v1168_v45 = vpop.f32.mrb[10].mxu0 }
 0x403   : > { %v2132_v46 = vpop.f32.mrb[11].mxu0  ;;  %v2394_v45 = vld [vmem:[#allocation12] sm:$0xff]  }
 0x404   : > { %2152 = vmatpush3.bf16.msra.mxu0 %v2394_v45 }
 0x405   : > { %2153 = vmatprep.subr.bf16.mxu0 %v2986_v0 }
 0x408   : > { %v1295_v47 = vpop.f32.mrb[12].mxu0 }
 0x409   : > { %v2143_v48 = vpop.f32.mrb[13].mxu0  ;;  %v1301_v49 = vsel %vm870_vm3, %v1295_v47, -inf }
 0x40a   : > { %1302 = vmax.xlane.f32.xlu0 %v1301_v49  ;;  %v1298_v50 = vpop.f32.mrb[14].mxu0 }
 0x40b   : > { %v2144_v51 = vpop.f32.mrb[15].mxu0 }
 0x412   : > { %v919_v52 = vpop.xlane.xlu0 %918 }
 0x413   : > { %v920_v53 = vsub.f32 %v911_v32, %v919_v52 }
 0x415   : > { %v921_v54 = vmul.f32 1.442695, %v920_v53 }
 0x417   : > { %2402 = vpow2.f32 %v921_v54 }
 0x421   : > { %v2403_v55 = vpop.eup %2402 }
 0x422   : > { %v923_v56 = vsel %vm870_vm3, %v2403_v55, 0.0 }
 0x423   : > { %924 = vadd.xlane.f32.xlu1 %v923_v56 }
 0x434   : > { %934 = vrot.lane.b32.xlu1 %v2013_v57, %s2991_s0  ;;  %s3849_s0 = smov %s3848_s21 }
 0x487   : > { %v1043_v58 = vpop.xlane.xlu1 %1042 }
 0x488   : > { %v1044_v59 = vsub.f32 %v1035_v37, %v1043_v58 }
 0x48a   : > { %v1045_v60 = vmul.f32 1.442695, %v1044_v59 }
 0x48c   : > { %2404 = vpow2.f32 %v1045_v60 }
 0x48f   : > { %v1173_v61 = vpop.xlane.xlu0 %1172 }
 0x490   : > { %v1174_v62 = vsub.f32 %v1165_v42, %v1173_v61  ;;  %v2027_v61 = vld [vmem:[#allocation13] ss:$0 sm:$0xff] }
 0x492   : > { %v1175_v63 = vmul.f32 1.442695, %v1174_v62 }
 0x494   : > { %2406 = vpow2.f32 %v1175_v63 }
 0x496   : > { %v2405_v1 = vpop.eup %2404 }
 0x497   : > { %v1303_v2 = vpop.xlane.xlu0 %1302  ;;  %v1047_v3 = vsel %vm870_vm3, %v2405_v1, 0.0 }
 0x498   : > { %v1304_v4 = vsub.f32 %v1295_v47, %v1303_v2  ;;  %1048 = vadd.xlane.f32.xlu0 %v1047_v3  ;;  %v2395_v47 = vld [vmem:[#allocation12 + $0x8] sm:$0xff]  }
 0x499   : > { %2154 = vmatpush3.bf16.msra.mxu0 %v2395_v47 }
 0x49a   : > { %v1305_v5 = vmul.f32 1.442695, %v1304_v4  ;;  %2167 = vmatprep.subr.bf16.mxu0 %v2986_v0 }
 0x49c   : > { %2408 = vpow2.f32 %v1305_v5 }
 0x49e   : > { %v2407_v7 = vpop.eup %2406 }
 0x49f   : > { %v1177_v8 = vsel %vm870_vm3, %v2407_v7, 0.0 }
 0x4a0   : > { %1178 = vadd.xlane.f32.xlu1 %v1177_v8 }
 0x4a6   : > { %v2409_v9 = vpop.eup %2408 }
 0x4a7   : > { %v1307_v10 = vsel %vm870_vm3, %v2409_v9, 0.0 }
 0x4a8   : > { %1308 = vadd.xlane.f32.xlu0 %v1307_v10 }
 0x4b0   : > { %v925_v11 = vpop.xlane.xlu1 %924 }
 0x4b1   : > { %2410 = vrcp.f32 %v925_v11  ;;  %1190 = vrot.lane.b32.xlu1 %v3563_v16, %s2992_s30  ;;  %s3676_s30 = scalar_lea.hbm %s3848_s21, %s2047_s2 }
 0x4b4   : > { %v935_v12 = vpop.permute.xlu1 %934 }
 0x4b5   : > { %v941_v13 = vsel %vm939_vm4, %v935_v12, 0  ;;  %1320 = vrot.lane.b32.xlu1 %v3573_v22, %s2993_s6  ;;  %s1691_s6 = scalar_lea.sflag [#allocation29], %s3494_s4 }
 0x4b6   : > { %2110 = vmatpush3.bf16.msra.mxu1 %v941_v13  ;;  %v2396_v13 = vld [vmem:[#allocation18] sm:$0xff]  }
 0x4b7   : > { %2121 = vmatprep.subr.bf16.mxu1 %v2986_v0 }
 0x4bb   : > { %v2411_v14 = vpop.eup %2410 }
 0x4bc   : > { %v928_v15 = vmul.f32 %v2411_v14, %v2403_v55  ;;  %v2397_v14 = vld [vmem:[#allocation18 + $0x8] sm:$0xff]  }
 0x4be   : > { %1060 = vrot.lane.b32.xlu0 %v3567_v18, %s2994_s15  ;;  %v930_v17 = vpack.c.bf16 %v928_v15, %v928_v15  ;;  %929 = vst.msk [vmem:[%s3609_s27] sm:$0xff] %vm870_vm3, %v928_v15  ;;  %s2822_s15 = scalar_lea.vmem %s3678_s16, 128 }
 0x4bf   : > { %p2823_p10 = scmp.ne.s32.totalorder %s3678_s16, %s2822_s15 }
 0x4c0   : > { %2112 = vmatmul.mubr.msk.bf16.vlgmr.msra.gmra.mrb[8].mxu1 %vm870_vm3, %v930_v17 }
 0x4c1   : > { %2123 = vmatprep.mubr.msk.bf16.mxu1 %vm2987_vm0, %v2986_v0  ;;  %p2824_p5 = pnand %p2823_p10, %p3850_p1 }
 0x4c3   : > { %p2825_p8 = pneg %p2824_p5 }
 0x525   : > { %v1049_v16 = vpop.xlane.xlu0 %1048 }
 0x526   : > { %2412 = vrcp.f32 %v1049_v16 }
 0x52d   : > { %v1179_v19 = vpop.xlane.xlu1 %1178 }
 0x52e   : > { %2414 = vrcp.f32 %v1179_v19  ;;  %v2031_v19 = vld [vmem:[#allocation15] ss:$0 sm:$0xff] }
 0x530   : > { %v2413_v20 = vpop.eup %2412 }
 0x531   : > { %v3616_v22 = vmul.f32 %v2413_v20, %v2405_v1  ;;  %v1191_v24 = vpop.permute.xlu1 %1190 }
 0x532   : > { %v1196_v27 = vsel %vm939_vm4, %v1191_v24, 0 }
 0x533   : > { %v1059_v25 = vpack.c.bf16 %v3616_v22, %v3616_v22 }
 0x535   : > { %v1309_v21 = vpop.xlane.xlu0 %1308  ;;  %v1321_v29 = vpop.permute.xlu1 %1320 }
 0x536   : > { %2416 = vrcp.f32 %v1309_v21  ;;  %v1326_v32 = vsel %vm939_vm4, %v1321_v29, 0  ;;  %v2032_v21 = vld [vmem:[#allocation16] ss:$0 sm:$0xff]  ;;  %v2033_v29 = vld [vmem:[#allocation19] ss:$0 sm:$0xff] }
 0x538   : > { %v2415_v26 = vpop.eup %2414 }
 0x539   : > { %v1061_v18 = vpop.permute.xlu0 %1060  ;;  %v3626_v28 = vmul.f32 %v2415_v26, %v2407_v7  ;;  %v2399_v26 = vld [vmem:[#allocation21 + $0x8] sm:$0xff]  }
 0x53a   : > { %v1066_v23 = vsel %vm939_vm4, %v1061_v18, 0 }
 0x53b   : > { %2122 = vmatpush3.bf16.msra.mxu1 %v1066_v23  ;;  %v1189_v30 = vpack.c.bf16 %v3626_v28, %v3626_v28 }
 0x53c   : > { %2133 = vmatprep.subr.bf16.mxu1 %v2986_v0 }
 0x53e   : > { %2124 = vmatmul.mubr.msk.bf16.vlgmr.msra.gmra.mrb[12].mxu1 %vm870_vm3, %v1059_v25  ;;  %v2398_v25 = vld [vmem:[#allocation21] sm:$0xff]  }
 0x53f   : > { %2134 = vmatpush3.bf16.msra.mxu1 %v1196_v27  ;;  %2135 = vmatprep.mubr.msk.bf16.mxu1 %vm2987_vm0, %v2986_v0  ;;  %v2400_v27 = vld [vmem:[#allocation21 + $0x10] sm:$0xff]  }
 0x540   : > { %2145 = vmatprep.subr.bf16.mxu1 %v2986_v0  ;;  %v2417_v31 = vpop.eup %2416 }
 0x541   : > { %v3635_v33 = vmul.f32 %v2417_v31, %v2409_v9 }
 0x543   : > { %v1319_v34 = vpack.c.bf16 %v3635_v33, %v3635_v33 }
 0x546   : > { %2136 = vmatmul.mubr.msk.bf16.vlgmr.msra.gmra.mrb[16].mxu1 %vm870_vm3, %v1189_v30 }
 0x547   : > { %2146 = vmatpush3.bf16.msra.mxu1 %v1326_v32  ;;  %2147 = vmatprep.mubr.msk.bf16.mxu1 %vm2987_vm0, %v2986_v0 }
 0x548   : > { %2159 = vmatprep.subr.bf16.mxu1 %v2986_v0 }
 0x54e   : > { %2148 = vmatmul.mubr.msk.bf16.vlgmr.msra.gmra.mrb[20].mxu1 %vm870_vm3, %v1319_v34 }
 0x54f   : > { %2163 = vmatprep.mubr.msk.bf16.mxu1 %vm2987_vm0, %v2986_v0  ;;  %2160 = vmatpush3.bf16.msra.mxu1 %v2396_v13 }
 0x550   : > { %2161 = vmatprep.subr.bf16.mxu1 %v2986_v0 }
 0x553   : > { %2162 = vmatpush3.bf16.msra.mxu1 %v2397_v14 }
 0x593   : > { %v977_v35 = vpop.f32.mrb[8].mxu1 }
 0x594   : > { %v983_v36 = vpack.c.bf16 %v977_v35, %v977_v35  ;;  %v2113_v37 = vpop.f32.mrb[9].mxu1 }
 0x595   : > { %v980_v38 = vpop.f32.mrb[10].mxu1 }
 0x596   : > { %985 = vst.msk [vmem:[#allocation3] sm:$0xf] %vm984_vm5, %v983_v36  ;;  %v2114_v39 = vpop.f32.mrb[11].mxu1 }
 0x611   : > { %v1102_v40 = vpop.f32.mrb[12].mxu1 }
 0x612   : > { %v2051_v41 = vpack.c.bf16 %v1102_v40, %v1102_v40  ;;  %v2125_v42 = vpop.f32.mrb[13].mxu1 }
 0x613   : > { %v1105_v43 = vpop.f32.mrb[14].mxu1 }
 0x614   : > { %1112 = vrot.lane.b32.xlu0 %v2051_v41, %s2995_s28  ;;  %v2126_v44 = vpop.f32.mrb[15].mxu1 }
 0x619   : > { %v1232_v46 = vpop.f32.mrb[16].mxu1 }
 0x61a   : > { %v2052_v48 = vpack.c.bf16 %v1232_v46, %v1232_v46  ;;  %v2137_v49 = vpop.f32.mrb[17].mxu1 }
 0x61b   : > { %v1235_v50 = vpop.f32.mrb[18].mxu1 }
 0x61c   : > { %1242 = vrot.lane.b32.xlu1 %v2052_v48, %s2996_s5  ;;  %v2138_v51 = vpop.f32.mrb[19].mxu1 }
 0x621   : > { %v1362_v52 = vpop.f32.mrb[20].mxu1 }
 0x622   : > { %v2053_v53 = vpack.c.bf16 %v1362_v52, %v1362_v52  ;;  %v2149_v54 = vpop.f32.mrb[21].mxu1 }
 0x623   : > { %v1365_v55 = vpop.f32.mrb[22].mxu1 }
 0x624   : > { %1372 = vrot.lane.b32.xlu0 %v2053_v53, %s2997_s1  ;;  %v2150_v56 = vpop.f32.mrb[23].mxu1 }
 0x686   : > { %v1113_v57 = vpop.permute.xlu0 %1112 }
 0x687   : > { %1116 = vst.msk [vmem:[#allocation3] sm:$0xf] %vm1115_vm6, %v1113_v57 }
 0x68e   : > { %v1243_v58 = vpop.permute.xlu1 %1242 }
 0x68f   : > { %1246 = vst.msk [vmem:[#allocation3] sm:$0xf] %vm1245_vm7, %v1243_v58 }
 0x696   : > { %v1373_v59 = vpop.permute.xlu0 %1372 }
 0x697   : > { %1376 = vst.msk [vmem:[#allocation3] sm:$0xf] %vm1375_vm8, %v1373_v59 }
 0x69e   : > { %v1377_v60 = vld [vmem:[#allocation3] sm:$0xf] }
 0x69f   : > { %2156 = vmatmul.mubr.msk.bf16.vlgmr.msra.gmra.mrb[16].mxu0 %vm759_vm1, %v1377_v60 }
 0x6a0   : > { %2175 = vmatprep.mubr.msk.bf16.mxu0 %vm2987_vm0, %v2986_v0  ;;  %2168 = vmatpush3.bf16.msra.mxu0 %v2398_v25 }
 0x6a1   : > { %2169 = vmatprep.subr.bf16.mxu0 %v2986_v0 }
 0x6a4   : > { %2170 = vmatpush3.bf16.msra.mxu0 %v2399_v26 }
 0x6a5   : > { %2171 = vmatprep.subr.bf16.mxu0 %v2986_v0 }
 0x6a8   : > { %2172 = vmatpush3.bf16.msra.mxu0 %v2400_v27 }
 0x6a9   : > { %2173 = vmatprep.subr.bf16.mxu0 %v2986_v0 }
 0x772   : > { %v1438_v62 = vpop.f32.mrb[16].mxu0 }
 0x773   : > { %v1439_v63 = vadd.f32 %v2027_v61, %v1438_v62  ;;  %v2157_v1 = vpop.f32.mrb[17].mxu0  ;;  %v2037_v61 = vld [vmem:[#allocation22] ss:$0 sm:$0xff] }
 0x774   : > { %v1441_v2 = vpop.f32.mrb[18].mxu0 }
 0x775   : > { %v1444_v3 = vmax.f32 %v1439_v63, 0.0  ;;  %v2158_v4 = vpop.f32.mrb[19].mxu0 }
 0x777   : > { %v1445_v5 = vadd.f32 %v1444_v3, %v3552_v6 }
 0x779   : > { %v1448_v7 = vsel %vm759_vm1, %v1445_v5, 0.0 }
 0x77a   : > { %1449 = vadd.xlane.f32.xlu1 %v1448_v7 }
 0x78b   : > { %1184 = vrot.lane.b32.xlu1 %v3626_v28, %s2996_s5  ;;  %v2401_v28 = vld [vmem:[#allocation21 + $0x18] sm:$0xff]  }
 0x78c   : > { %2174 = vmatpush3.bf16.msra.mxu0 %v2401_v28 }
 0x807   : > { %v1450_v8 = vpop.xlane.xlu1 %1449 }
 0x808   : > { %v1452_v9 = vmul.f32 0.03125, %v1450_v8 }
 0x80a   : > { %v1453_v10 = vsub.f32 %v1445_v5, %v1452_v9 }
 0x80c   : > { %v1454_v11 = vmul.f32 %v1453_v10, %v1453_v10 }
 0x80e   : > { %v1455_v12 = vsel %vm759_vm1, %v1454_v11, 0.0  ;;  %v1185_v11 = vpop.permute.xlu1 %1184 }
 0x80f   : > { %1456 = vadd.xlane.f32.xlu0 %v1455_v12 }
 0x89c   : > { %v1457_v6 = vpop.xlane.xlu0 %1456 }
 0x89d   : > { %v1458_v15 = vmul.f32 0.03125, %v1457_v6 }
 0x89f   : > { %v1459_v17 = vadd.f32 1e-05, %v1458_v15 }
 0x8a1   : > { %2418 = vrsqrt.f32 %v1459_v17 }
 0x8ab   : > { %v2419_v16 = vpop.eup %2418 }
 0x8ac   : > { %v1461_v20 = vmul.f32 %v2419_v16, %v1453_v10 }
 0x8ae   : > { %v1468_v18 = vmul.f32 %v2031_v19, %v1461_v20 }
 0x8b0   : > { %v1475_v23 = vadd.f32 %v2032_v21, %v1468_v18 }
 0x8b2   : > { %v1476_v24 = vpack.c.bf16 %v1475_v23, %v1475_v23 }
 0x8b4   : > { %2164 = vmatmul.mubr.msk.bf16.vlgmr.msra.gmra.mrb[24].mxu1 %vm759_vm1, %v1476_v24 }
 0x987   : > { %v1537_v30 = vpop.f32.mrb[24].mxu1 }
 0x988   : > { %v1538_v31 = vadd.f32 %v2033_v29, %v1537_v30  ;;  %v2165_v32 = vpop.f32.mrb[25].mxu1 }
 0x989   : > { %v1540_v34 = vpop.f32.mrb[26].mxu1 }
 0x98a   : > { %v1544_v35 = vmul.f32 0.70710677, %v1538_v31  ;;  %v2166_v36 = vpop.f32.mrb[27].mxu1  ;;  %v1543_v57 = vmul.f32 0.5, %v1538_v31 }
 0x98c   : > { %v1545_v37 = vand.u32 2147483647, %v1544_v35  ;;  %vm1565_vm9 = vcmp.ge.f32.partialorder %v1544_v35, 0.0 }
 0x98e   : > { %v1546_v38 = vmul.f32 0.3275911, %v1545_v37  ;;  %v1559_v40 = vsub.f32 0.0, %v1545_v37 }
 0x990   : > { %v1547_v39 = vadd.f32 1.0, %v1546_v38  ;;  %v1560_v42 = vmul.f32 %v1559_v40, %v1545_v37 }
 0x992   : > { %2420 = vrcp.f32 %v1547_v39  ;;  %v1561_v45 = vmul.f32 1.442695, %v1560_v42 }
 0x994   : > { %2422 = vpow2.f32 %v1561_v45 }
 0x99c   : > { %v2421_v41 = vpop.eup %2420 }
 0x99d   : > { %v1550_v43 = vmul.f32 1.0614054, %v2421_v41 }
 0x99e   : > { %v2423_v52 = vpop.eup %2422 }
 0x99f   : > { %v1551_v44 = vadd.f32 -1.4531521, %v1550_v43 }
 0x9a1   : > { %v1552_v0 = vmul.f32 %v2421_v41, %v1551_v44 }
 0x9a3   : > { %v1553_v46 = vadd.f32 1.4214138, %v1552_v0 }
 0x9a5   : > { %v1554_v47 = vmul.f32 %v2421_v41, %v1553_v46 }
 0x9a7   : > { %v1555_v48 = vadd.f32 -0.28449672, %v1554_v47 }
 0x9a9   : > { %v1556_v49 = vmul.f32 %v2421_v41, %v1555_v48 }
 0x9ab   : > { %v1557_v50 = vadd.f32 0.2548296, %v1556_v49 }
 0x9ad   : > { %v1558_v51 = vmul.f32 %v2421_v41, %v1557_v50 }
 0x9af   : > { %v1563_v53 = vmul.f32 %v2423_v52, %v1558_v51 }
 0x9b1   : > { %v1564_v54 = vsub.f32 1.0, %v1563_v53 }
 0x9b3   : > { %v1566_v55 = vsub.f32 0.0, %v1564_v54 }
 0x9b5   : > { %v1567_v56 = vsel %vm1565_vm9, %v1564_v54, %v1566_v55 }
 0x9b6   : > { %v1568_v58 = vadd.f32 1.0, %v1567_v56 }
 0x9b8   : > { %v1569_v59 = vmul.f32 %v1568_v58, %v1543_v57 }
 0x9ba   : > { %v1570_v60 = vpack.c.bf16 %v1569_v59, %v1569_v59 }
 0x9bc   : > { %2176 = vmatmul.mubr.msk.bf16.vlgmr.msra.gmra.mrb[20].mxu0 %vm1610_vm10, %v1570_v60 }
 0xa8f   : > { %v1648_v62 = vpop.f32.mrb[20].mxu0 }
 0xa90   : > { %v1649_v63 = vadd.f32 %v2037_v61, %v1648_v62  ;;  %v2177_v1 = vpop.f32.mrb[21].mxu0 }
 0xa91   : > { %v1651_v2 = vpop.f32.mrb[22].mxu0 }
 0xa92   : > { %v2178_v3 = vpop.f32.mrb[23].mxu0  ;;  %v1654_v4 = vadd.f32 %v1649_v63, %v1475_v23 }
 0xa94   : > { %v1657_v5 = vsel %vm759_vm1, %v1654_v4, 0.0 }
 0xa95   : > { %1658 = vadd.xlane.f32.xlu0 %v1657_v5 }
 0xaab   : > { %1054 = vrot.lane.b32.xlu0 %v3616_v22, %s2995_s28  ;;  %s2998_s28 = smov [#allocation28]  }
 0xaac   : > { %s2826_s5 = sshll.u32 %s2998_s28, 4  ;;  %s2827_s5 = int_to_ptr.vmem [resolvable:$false] %s2826_s5 }
 0xaad   : > { %p2829_p3 = scmp.lt.s32.totalorder %s3678_s16, %s2827_s5 }
 0xb22   : > { %v1659_v7 = vpop.xlane.xlu0 %1658 }
 0xb23   : > { %v1660_v8 = vmul.f32 0.03125, %v1659_v7 }
 0xb25   : > { %v1661_v9 = vsub.f32 %v1654_v4, %v1660_v8 }
 0xb26   : > { %v1055_v10 = vpop.permute.xlu0 %1054 }
 0xb27   : > { %1058 = vst.msk [vmem:[%s3609_s27] sm:$0xff] %vm1057_vm11, %v1055_v10  ;;  %v1662_v12 = vmul.f32 %v1661_v9, %v1661_v9 }
 0xb28   : > { %1188 = vst.msk [vmem:[%s3609_s27] sm:$0xff] %vm1187_vm12, %v1185_v11 }
 0xb29   : > { %v1663_v13 = vsel %vm759_vm1, %v1662_v12, 0.0 }
 0xb2a   : > { %1664 = vadd.xlane.f32.xlu1 %v1663_v13 }
 0xb3b   : > { %1314 = vrot.lane.b32.xlu1 %v3635_v33, %s2997_s1  ;;  %s2828_s1 = scalar_lea.vmem %s2827_s5, 256 }
 0xb3c   : > { %p2830_p11 = scmp.lt.s32.totalorder %s2828_s1, %s2822_s15 }
 0xb3e   : > { %p2831_p6 = por %p2830_p11, %p2829_p3 }
 0xb40   : > { %p2832_p13 = pnand %p2831_p6, %p2825_p8 }
 0xbb7   : > { %v1665_v22 = vpop.xlane.xlu1 %1664 }
 0xbb8   : > { %v1666_v14 = vmul.f32 0.03125, %v1665_v22 }
 0xbba   : > { %v1667_v6 = vadd.f32 1e-05, %v1666_v14 }
 0xbbb   : > { %v1315_v15 = vpop.permute.xlu1 %1314 }
 0xbbc   : > { %2424 = vrsqrt.f32 %v1667_v6  ;;  %1318 = vst.msk [vmem:[%s3609_s27] sm:$0xff] %vm1317_vm13, %v1315_v15 }
 0xbbd   : > { %2835 = shalt.err (!%p2832_p13)
}
 0xbbe   : > { %s2836_s27 = scalar_lea.hbm %s3676_s30, 128  ;;  %s2840_s21 = scalar_lea.hbm %s3849_s0, 256 }
 0xbbf   : > { %p2837_p4 = scmp.ne.s32.totalorder %s3676_s30, %s2836_s27  ;;  %p2841_p7 = scmp.lt.u32.totalorder %s3676_s30, %s3849_s0 }
 0xbc0   : > { %p2842_p12 = scmp.lt.u32.totalorder %s2840_s21, %s2836_s27  ;;  %p2844_p10 = scmp.lt.u32.totalorder %s2836_s27, %s3676_s30 }
 0xbc1   : > { %p2838_p9 = pnand %p2837_p4, %p3850_p1 }
 0xbc2   : > { %p2843_p2 = por %p2842_p12, %p2841_p7 }
 0xbc3   : > { %p2839_p0 = pneg %p2838_p9 }
 0xbc4   : > { %p2845_p5 = por %p2844_p10, %p2843_p2 }
 0xbc6   : > { %p2846_p8 = pnand %p2845_p5, %p2839_p0 }
 0xbc8   : > { %2849 = shalt.err (!%p2846_p8)
}
 0xbc9   : > { %2232 = dma.vmem_to_hbm [thread:$0]  (%p3850_p1), %s3678_s16, 128, %s3676_s30, %s1691_s6   ;;  %v2425_v33 = vpop.eup %2424  ;;  %v2043_v17 = vld [vmem:[#allocation24] ss:$0 sm:$0xff]  ;;  %v2044_v19 = vld [vmem:[#allocation25] ss:$0 sm:$0xff] }
 0xbca   : > { %v1669_v16 = vmul.f32 %v2425_v33, %v1661_v9  ;;  %s729_s15 = scalar_lea.vmem [#allocation27], %s3497_s19  ;;  %s3851_s14 = sld [smem:[#allocation53_spill]] }
 0xbcb   : > { %s1705_s1 = sshll.u32 %s729_s15, 4  ;;  %s1686_s16 = scalar_lea.sflag [#allocation6], %s3494_s4  ;;  %s3711_s1 = int_to_ptr.vmem [resolvable:$true] %s1705_s1 }
 0xbcc   : > { %v1676_v20 = vmul.f32 %v2043_v17, %v1669_v16  ;;  %s2850_s30 = scalar_lea.vmem %s3711_s1, 128  ;;  %s2999_s19 = smov [#allocation27]  }
 0xbcd   : > { %p2851_p3 = scmp.ne.s32.totalorder %s3711_s1, %s2850_s30  ;;  %s2854_s25 = sshll.u32 %s2999_s19, 4  ;;  %s2855_s25 = int_to_ptr.vmem [resolvable:$false] %s2854_s25 }
 0xbce   : > { %v1683_v21 = vadd.f32 %v2044_v19, %v1676_v20  ;;  %s2856_s6 = scalar_lea.vmem %s2855_s25, 256  ;;  %p2857_p13 = scmp.lt.s32.totalorder %s3711_s1, %s2855_s25 }
 0xbcf   : > { %p2852_p11 = pnand %p2851_p3, %p3850_p1  ;;  %p2858_p4 = scmp.lt.s32.totalorder %s2856_s6, %s2850_s30 }
 0xbd0   : > { %s3709_s21 = scalar_lea.hbm %s3851_s14, %s2047_s2  ;;  %1684 = vst.msk [vmem:[%s729_s15] sm:$0xff] %vm759_vm1, %v1683_v21 }
 0xbd1   : > { %p2853_p6 = pneg %p2852_p11  ;;  %p2859_p9 = por %p2858_p4, %p2857_p13 }
 0xbd3   : > { %p2860_p0 = pnand %p2859_p9, %p2853_p6 }
 0xbd5   : > { %2863 = shalt.err (!%p2860_p0)
}
 0xbd6   : > { %s2864_s4 = scalar_lea.hbm %s3709_s21, 128  ;;  %s2868_s5 = scalar_lea.hbm %s3851_s14, 256 }
 0xbd7   : > { %p2865_p7 = scmp.ne.s32.totalorder %s3709_s21, %s2864_s4  ;;  %p2869_p10 = scmp.lt.u32.totalorder %s3709_s21, %s3851_s14 }
 0xbd8   : > { %p2870_p5 = scmp.lt.u32.totalorder %s2868_s5, %s2864_s4  ;;  %p2872_p3 = scmp.lt.u32.totalorder %s2864_s4, %s3709_s21 }
 0xbd9   : > { %p2866_p12 = pnand %p2865_p7, %p3850_p1 }
 0xbda   : > { %p2871_p8 = por %p2870_p5, %p2869_p10 }
 0xbdb   : > { %p2867_p2 = pneg %p2866_p12 }
 0xbdc   : > { %p2873_p11 = por %p2872_p3, %p2871_p8 }
 0xbde   : > { %p2874_p6 = pnand %p2873_p11, %p2867_p2 }
 0xbe0   : > { %2877 = shalt.err (!%p2874_p6)
}
 0xbe1   : > { %2231 = dma.vmem_to_hbm [thread:$0]  (%p3850_p1), %s3711_s1, 128, %s3709_s21, %s1686_s16  }
 0xbe2 PF: > { %s3852_s17 = sld [smem:[#allocation41_spill]]  ;;  %p3853_p13 = scmp.ne.s32.totalorder %s3822_s26, 0 }
 0xbe3   : > { %p3854_p4 = scmp.ge.s32.totalorder %s2968_s23, 2 }
 0xbe5   : > { %p2280_p9 = pnand %p3854_p4, %p3853_p13 }
 0xbe8   : > { %s1731_s30 = sand.u32 1, %s3852_s17  }
 0xbe9   : > { %s1732_s19 = scalar_lea.sflag [#allocation6], %s1731_s30 }
 0xbea   : > { %2939 = dma.done.wait (!%p2280_p9), %s1732_s19, 128  }
 0xbeb   : > { %2941 = vsyncadd (!%p2280_p9), %s1732_s19, 4294967168  ;;  %s1741_s25 = scalar_lea.sflag [#allocation29], %s1731_s30 }
 0xbec   : > { %2943 = dma.done.wait (!%p2280_p9), %s1741_s25, 128  }
 0xbed   : > { %2945 = vsyncadd (!%p2280_p9), %s1741_s25, 4294967168  ;;  %s44_s23 = sadd.s32 1, %s2968_s23   ;;  %s3855_s24 = sld [smem:[#allocation42_spill]] }
 0xbee   : > { %p41_p0 = scmp.ge.s32.totalorder %s44_s23, 4   ;;  %s3856_s1 = smov %s3411_s18 }
 0xbef   : > { %s3858_s19 = smov %s2956_s20  ;;  %s3859_s20 = smov %s3856_s1 }
 0xbf0   : > { %s3860_s21 = smov %s2964_s22  ;;  %s3861_s22 = smov %s3863_s29 }
 0xbf1   :  { %43 = sbr.rel (!%p41_p0) target bundleno = 26 (0x1a), region = 203 }
 0xbf3   : > { %s3857_s18 = smov %s3855_s24 }
 0xbf8   :  { %1746 = vsyncpa [#allocation5], 1 }
 0xbf9   :  { %1748 = vsyncpa [#allocation5 + $0x1], 1 }
 0xbfa   :  { %1749 = vsyncpa [#allocation8], 1 }
 0xbfb   :  { %1751 = vsyncpa [#allocation8 + $0x1], 1 }
 0xbfc   :  { %1752 = vsyncpa [#allocation11], 1 }
 0xbfd   :  { %1753 = vsyncpa [#allocation14], 1 }
 0xbfe   :  { %1754 = vsyncpa [#allocation17], 1 }
 0xbff   :  { %1755 = vsyncpa [#allocation20], 1 }
 0xc00   :  { %1756 = vsyncpa [#allocation23], 1 }
 0xc01   :  { %1757 = vsyncpa [#allocation26], 1 }
 0xc02   :  { %1758 = vsyncpa [#allocation6], 1 }
 0xc03   :  { %1760 = vsyncpa [#allocation6 + $0x1], 1 }
 0xc04   :  { %1761 = vsyncpa [#allocation29], 1 }
 0xc05   :  { %1763 = vsyncpa [#allocation29 + $0x1], 1 }

</bundles_post_ra>
